<compile_context>
chip_gen: v5e
topology: v5e:2x2
jax: 0.10.0
libtpu: 0.0.40
codegen_flags: <defaults>
</compile_context>

<pallas_src>
import functools

import jax
import jax.numpy as jnp
import numpy as np
from jax.experimental import pallas as pl
from jax.experimental.pallas import tpu as pltpu

# ----------------------------- model constants ------------------------------
NR_FEATURES = 32           # nr_features
NR_EXPERTS = 5             # nr_experts (E)
HIDDEN = 16                # hidden_dims=[16]
NR_CONTEXT = 8
NR_CANDIDATES = 8
NR_IMAGES = NR_CONTEXT + NR_CANDIDATES          # 16
NR_INPUT_IMAGES = NR_CONTEXT + 1                # 9
FE_DIM = 1                                      # feature_embedding_dim
NR_IND_FEATURES = NR_FEATURES // FE_DIM         # 32 (F)
REDUCTION = 3                                   # reduction_groups=[3]

F = NR_IND_FEATURES
E = NR_EXPERTS
H = HIDDEN
R = REDUCTION
EH = E * H                                      # 80

# ------------------------- packed parameter slab layout ----------------------
# rows 0..79  : cols 0..7  = W1_ctx^T (80,8), col 8 = w1_cand (80,), col 9 = b1 (80,)
# rows 80..84 : cols 0..79 = W2^T block-diagonal (5,80),        col 80 = b2 (5,)
# rows 88..90 : cols 0..4  = wr^T (3,5), col 5 = br (3,), col 6 = wf (3,)
# row  91     : col 0      = bf
_ROW_L2 = 80
_ROW_SC = 88
_ROW_FB = 91
SLAB_ROWS = 96
SLAB_COLS = 128


# ------------------------------ Pallas kernel -------------------------------
def _analogy_kernel(xT_ref, pk_ref, g_ref, latent_ref, logit_ref):
    # xT_ref block: (16, TB*F)  rows 0..7 context panels, rows 8..15 candidates;
    #               lane index = local_batch * F + feature.
    # g_ref       : (TB*F, TB) segment-mean matrix (1/F on own-batch lanes).
    # latent_ref  : (1, 8, E, TB*F)   lane-dense latent-logit slab.
    # logit_ref   : (1, 8, TB)        per-candidate score rows.

    # --- parameters (static slices of the single packed slab, hoisted) ---
    w1c_t = pk_ref[0:EH, 0:NR_CONTEXT]                       # (80, 8)
    w1cnd = pk_ref[0:EH, NR_CONTEXT:NR_CONTEXT + 1]          # (80, 1)
    b1c = pk_ref[0:EH, NR_CONTEXT + 1:NR_CONTEXT + 2]        # (80, 1)
    w2_t = pk_ref[_ROW_L2:_ROW_L2 + E, 0:EH]                 # (5, 80) block-diag
    b2c = pk_ref[_ROW_L2:_ROW_L2 + E, EH:EH + 1]             # (5, 1)
    wr_t = pk_ref[_ROW_SC:_ROW_SC + R, 0:E]                  # (3, 5)
    brc = pk_ref[_ROW_SC:_ROW_SC + R, E:E + 1]               # (3, 1)
    wfc = pk_ref[_ROW_SC:_ROW_SC + R, E + 1:E + 2]           # (3, 1)
    bfv = pk_ref[_ROW_FB:_ROW_FB + 1, 0:1]                   # (1, 1)

    ctx = xT_ref[0:NR_CONTEXT, :]                            # (8,  N)
    g = g_ref[...]                                           # (N, TB)

    # Expert layer 1, context part: shared by all 8 candidates -> one matmul.
    hc = jnp.dot(w1c_t, ctx, preferred_element_type=jnp.float32)     # (80, N)

    scores = []
    for c in range(NR_CANDIDATES):
        cand = xT_ref[NR_CONTEXT + c:NR_CONTEXT + c + 1, :]          # (1, N)
        # rank-1 candidate update + bias + ReLU (VPU)
        h = jnp.maximum(hc + w1cnd * cand + b1c, 0.0)                # (80, N)
        # expert layer 2 (block-diagonal, packed into one matmul)
        latent = jnp.dot(w2_t, h, preferred_element_type=jnp.float32) + b2c  # (5, N)
        latent_ref[0, c] = latent                                    # lane-dense store

        # softmax over experts (5 sublane rows) via explicit slices (VPU/EUP)
        m = jnp.maximum(
            jnp.maximum(latent[0:1], latent[1:2]),
            jnp.maximum(jnp.maximum(latent[2:3], latent[3:4]), latent[4:5]))
        ex = jnp.exp(latent - m)                                     # (5, N)
        s = ex[0:1] + ex[1:2] + ex[2:3] + ex[3:4] + ex[4:5]          # (1, N)

        # Scorer: r = relu(wr^T p + br) with p = ex / s  (shared denominator)
        numer = jnp.dot(wr_t, ex, preferred_element_type=jnp.float32)  # (3, N)
        r = jnp.maximum(numer * (1.0 / s) + brc, 0.0)                # (3, N)

        # mean over features as an MXU matmul against the segment matrix
        red = jnp.dot(r, g, preferred_element_type=jnp.float32)      # (3, TB)
        t = red * wfc                                                # (3, TB)
        scores.append(t[0:1] + t[1:2] + t[2:3] + bfv)                # (1, TB)

    logit_ref[0] = jnp.concatenate(scores, axis=0)                   # (8, TB)


# --------------------------------- wrapper -----------------------------------
def _pick_batch_tile(b):
    # TB*F must be a multiple of 128 (TB % 4 == 0) unless the block covers the
    # full batch; TB also keeps the logits/latent blocks (8,128)-legal.
    for tb in (64, 32, 16, 8, 4):
        if b % tb == 0:
            return tb
    return b


@jax.jit
def analogy_pallas_forward(x, param_slab):
    """x: (B, NR_IMAGES, NR_FEATURES) float32. Returns dict like the torch module."""
    B = x.shape[0]
    x = x.reshape(B, NR_IMAGES, NR_FEATURES).astype(jnp.float32)
    ind_features = x

    tb = _pick_batch_tile(B)
    nblk = B // tb
    n = tb * F                                       # lanes per block

    # image-major layout: (16, B*F), lane = batch*F + feature (NO 8x expansion)
    xT = jnp.transpose(x, (1, 0, 2)).reshape(NR_IMAGES, B * F)

    # segment-mean matrix: lane k belongs to local batch k // F
    g = (jnp.arange(n)[:, None] // F == jnp.arange(tb)[None, :]).astype(
        jnp.float32) * (1.0 / F)

    # advisory cost estimate for XLA scheduling
    flops_per_blk = (
        2 * EH * NR_CONTEXT * n
        + NR_CANDIDATES * (3 * EH * n + 2 * E * EH * n + 12 * E * n
                           + 2 * R * E * n + 2 * R * n * tb + 6 * R * tb))
    cost = pl.CostEstimate(
        flops=nblk * flops_per_blk,
        transcendentals=nblk * NR_CANDIDATES * E * n,
        bytes_accessed=4 * (xT.size + param_slab.size + g.size
                            + nblk * NR_CANDIDATES * E * n
                            + nblk * NR_CANDIDATES * tb))

    latent_t, logit_t = pl.pallas_call(
        _analogy_kernel,
        out_shape=(
            jax.ShapeDtypeStruct((nblk, NR_CANDIDATES, E, n), jnp.float32),
            jax.ShapeDtypeStruct((nblk, NR_CANDIDATES, tb), jnp.float32),
        ),
        grid=(nblk,),
        in_specs=[
            pl.BlockSpec((NR_IMAGES, n), lambda i: (0, i)),
            pl.BlockSpec((SLAB_ROWS, SLAB_COLS), lambda i: (0, 0)),
            pl.BlockSpec((n, tb), lambda i: (0, 0)),
        ],
        out_specs=[
            pl.BlockSpec((1, NR_CANDIDATES, E, n), lambda i: (i, 0, 0, 0)),
            pl.BlockSpec((1, NR_CANDIDATES, tb), lambda i: (i, 0, 0)),
        ],
        compiler_params=pltpu.CompilerParams(dimension_semantics=("parallel",)),
        cost_estimate=cost,
    )(xT, param_slab, g)

    # back to PyTorch layouts (small XLA transposes over lane-dense slabs)
    latent_logits = latent_t.reshape(nblk, NR_CANDIDATES, E, tb, F)
    latent_logits = jnp.transpose(latent_logits, (0, 3, 1, 4, 2)).reshape(
        B, NR_CANDIDATES, F, E)
    logits = jnp.transpose(logit_t, (0, 2, 1)).reshape(B, NR_CANDIDATES)
    return dict(logits=logits, latent_logits=latent_logits,
                ind_features=ind_features)


# ------------------------ deterministic parameter init ----------------------
def init_params(key):
    ks = jax.random.split(key, 8)
    w1 = jax.random.normal(ks[0], (E, NR_INPUT_IMAGES, H), jnp.float32) * 0.2
    b1 = jax.random.normal(ks[1], (E, H), jnp.float32) * 0.1
    w2 = jax.random.normal(ks[2], (E, H), jnp.float32) * 0.2      # H -> 1 per expert
    b2 = jax.random.normal(ks[3], (E,), jnp.float32) * 0.1
    wr = jax.random.normal(ks[4], (E, R), jnp.float32) * 0.2      # scorer reduction
    br = jax.random.normal(ks[5], (R,), jnp.float32) * 0.1
    wf = jax.random.normal(ks[6], (R,), jnp.float32) * 0.2        # scorer final
    bf = jax.random.normal(ks[7], (1,), jnp.float32) * 0.1
    return dict(w1=w1, b1=b1, w2=w2, b2=b2, wr=wr, br=br, wf=wf, bf=bf)


def pack_params(p):
    """Pack all parameters into one (96,128) slab for a single VMEM-resident DMA."""
    slab = np.zeros((SLAB_ROWS, SLAB_COLS), np.float32)
    w1 = np.asarray(p["w1"])                                  # (E, 9, H)
    w1p = np.transpose(w1, (1, 0, 2)).reshape(NR_INPUT_IMAGES, EH)  # col = e*H+h
    slab[0:EH, 0:NR_CONTEXT] = w1p[:NR_CONTEXT].T             # (80, 8)
    slab[0:EH, NR_CONTEXT] = w1p[NR_CONTEXT]                  # candidate row
    slab[0:EH, NR_CONTEXT + 1] = np.asarray(p["b1"]).reshape(EH)
    w2 = np.asarray(p["w2"])
    for e in range(E):
        slab[_ROW_L2 + e, e * H:(e + 1) * H] = w2[e]          # block-diagonal W2^T
    slab[_ROW_L2:_ROW_L2 + E, EH] = np.asarray(p["b2"])
    slab[_ROW_SC:_ROW_SC + R, 0:E] = np.asarray(p["wr"]).T
    slab[_ROW_SC:_ROW_SC + R, E] = np.asarray(p["br"])
    slab[_ROW_SC:_ROW_SC + R, E + 1] = np.asarray(p["wf"])
    slab[_ROW_FB, 0] = np.asarray(p["bf"])[0]
    return jnp.asarray(slab)


# -------------------------- pure-JAX reference check -------------------------
def reference_forward(x, p):
    B = x.shape[0]
    x = x.reshape(B, NR_IMAGES, NR_FEATURES).astype(jnp.float32)
    ctx = x[:, :NR_CONTEXT]
    cand = x[:, NR_CONTEXT:]
    ctx_b = jnp.broadcast_to(ctx[:, None],
                             (B, NR_CANDIDATES, NR_CONTEXT, NR_FEATURES))
    xt = jnp.concatenate([ctx_b, cand[:, :, None, :]], axis=2)       # (B,C,9,D)
    xt = jnp.transpose(xt, (0, 1, 3, 2)).reshape(B * NR_CANDIDATES, F,
                                                 NR_INPUT_IMAGES)
    outs = []
    for e in range(E):
        h = jnp.maximum(jnp.einsum("bfn,nh->bfh", xt, p["w1"][e]) + p["b1"][e], 0.0)
        outs.append(jnp.einsum("bfh,h->bf", h, p["w2"][e]) + p["b2"][e])
    latent = jnp.stack(outs, axis=-1)                                 # (Bc, F, E)
    probs = jax.nn.softmax(latent, axis=-1)
    r = jnp.maximum(jnp.einsum("bfe,er->bfr", probs, p["wr"]) + p["br"], 0.0)
    red = jnp.mean(r, axis=1)                                         # (Bc, R)
    logits = (red @ p["wf"].reshape(R, 1))[:, 0] + p["bf"][0]
    return dict(
        logits=logits.reshape(B, NR_CANDIDATES),
        latent_logits=latent.reshape(B, NR_CANDIDATES, F, E),
        ind_features=x,
    )


# ----------------------------------- main ------------------------------------
if __name__ == "__main__":
    B = 2
    key = jax.random.PRNGKey(0)
    x = jax.random.normal(key, (B, NR_IMAGES, NR_FEATURES), jnp.float32)

    params = init_params(jax.random.PRNGKey(42))
    param_slab = pack_params(params)

    out = analogy_pallas_forward(x, param_slab)
    out = jax.tree_util.tree_map(jax.block_until_ready, out)

    ref = reference_forward(x, params)
    np.testing.assert_allclose(np.asarray(out["latent_logits"]),
                               np.asarray(ref["latent_logits"]),
                               rtol=1e-5, atol=1e-5)
    np.testing.assert_allclose(np.asarray(out["logits"]),
                               np.asarray(ref["logits"]), rtol=1e-5, atol=1e-5)
    np.testing.assert_allclose(np.asarray(out["ind_features"]),
                               np.asarray(ref["ind_features"]),
                               rtol=1e-6, atol=1e-6)

    assert out["logits"].shape == (B, NR_CANDIDATES)
    assert out["latent_logits"].shape == (B, NR_CANDIDATES, F, E)
    assert out["ind_features"].shape == (B, NR_IMAGES, NR_FEATURES)
    print("KERNEL_OK")
</pallas_src>

<mosaic_0001>
module attributes {stable_mosaic.version = 11 : i64} {
  func.func @_analogy_kernel(%arg0: i32, %arg1: memref<16x64xf32, #tpu.memory_space<vmem>>, %arg2: memref<96x128xf32, #tpu.memory_space<vmem>>, %arg3: memref<64x2xf32, #tpu.memory_space<vmem>>, %arg4: memref<1x8x5x64xf32, #tpu.memory_space<vmem>>, %arg5: memref<1x8x2xf32, #tpu.memory_space<vmem>>) attributes {dimension_semantics = [#tpu.dimension_semantics<parallel>], iteration_bounds = array<i64: 1>, scalar_prefetch = 0 : i64, scratch_operands = 0 : i64, tpu.core_type = #tpu.core_type<tc>, window_params = [{transform_indices = @transform_0, window_bounds = array<i64: 16, 64>}, {pipeline_mode = #tpu.pipeline_mode<synchronous>, transform_indices = @transform_1, window_bounds = array<i64: 96, 128>}, {pipeline_mode = #tpu.pipeline_mode<synchronous>, transform_indices = @transform_2, window_bounds = array<i64: 64, 2>}, {transform_indices = @transform_3, window_bounds = array<i64: 1, 8, 5, 64>}, {transform_indices = @transform_4, window_bounds = array<i64: 1, 8, 2>}]} {
    %c0 = arith.constant 0 : index
    %c0_0 = arith.constant 0 : index
    %0 = vector.load %arg2[%c0, %c0_0] : memref<96x128xf32, #tpu.memory_space<vmem>>, vector<80x8xf32>
    %c0_1 = arith.constant 0 : index
    %c8 = arith.constant 8 : index
    %1 = vector.load %arg2[%c0_1, %c8] : memref<96x128xf32, #tpu.memory_space<vmem>>, vector<80x1xf32>
    %c0_2 = arith.constant 0 : index
    %c9 = arith.constant 9 : index
    %2 = vector.load %arg2[%c0_2, %c9] : memref<96x128xf32, #tpu.memory_space<vmem>>, vector<80x1xf32>
    %c80 = arith.constant 80 : index
    %c0_3 = arith.constant 0 : index
    %3 = vector.load %arg2[%c80, %c0_3] : memref<96x128xf32, #tpu.memory_space<vmem>>, vector<5x80xf32>
    %c80_4 = arith.constant 80 : index
    %c80_5 = arith.constant 80 : index
    %4 = vector.load %arg2[%c80_4, %c80_5] : memref<96x128xf32, #tpu.memory_space<vmem>>, vector<5x1xf32>
    %c88 = arith.constant 88 : index
    %c0_6 = arith.constant 0 : index
    %5 = vector.load %arg2[%c88, %c0_6] : memref<96x128xf32, #tpu.memory_space<vmem>>, vector<3x5xf32>
    %c88_7 = arith.constant 88 : index
    %c5 = arith.constant 5 : index
    %6 = vector.load %arg2[%c88_7, %c5] : memref<96x128xf32, #tpu.memory_space<vmem>>, vector<3x1xf32>
    %c88_8 = arith.constant 88 : index
    %c6 = arith.constant 6 : index
    %7 = vector.load %arg2[%c88_8, %c6] : memref<96x128xf32, #tpu.memory_space<vmem>>, vector<3x1xf32>
    %c91 = arith.constant 91 : index
    %c0_9 = arith.constant 0 : index
    %8 = vector.load %arg2[%c91, %c0_9] : memref<96x128xf32, #tpu.memory_space<vmem>>, vector<1x1xf32>
    %c0_10 = arith.constant 0 : index
    %c0_11 = arith.constant 0 : index
    %9 = vector.load %arg1[%c0_10, %c0_11] : memref<16x64xf32, #tpu.memory_space<vmem>>, vector<8x64xf32>
    %c0_12 = arith.constant 0 : index
    %c0_13 = arith.constant 0 : index
    %10 = vector.load %arg3[%c0_12, %c0_13] : memref<64x2xf32, #tpu.memory_space<vmem>>, vector<64x2xf32>
    %cst = arith.constant dense<0.000000e+00> : vector<80x64xf32>
    %11 = tpu.matmul %0, %9, %cst {dimension_numbers = #tpu.dot_dimension_numbers<[1], [0], [0], [1], [0, 0, 1, 1], [], []>} : vector<80x8xf32>, vector<8x64xf32>, vector<80x64xf32> -> vector<80x64xf32>
    %c8_14 = arith.constant 8 : index
    %c0_15 = arith.constant 0 : index
    %12 = vector.load %arg1[%c8_14, %c0_15] : memref<16x64xf32, #tpu.memory_space<vmem>>, vector<1x64xf32>
    %13 = vector.broadcast %1 : vector<80x1xf32> to vector<80x64xf32>
    %14 = vector.broadcast %12 : vector<1x64xf32> to vector<80x64xf32>
    %15 = arith.mulf %13, %14 : vector<80x64xf32>
    %16 = arith.addf %11, %15 : vector<80x64xf32>
    %17 = vector.broadcast %2 : vector<80x1xf32> to vector<80x64xf32>
    %18 = arith.addf %16, %17 : vector<80x64xf32>
    %cst_16 = arith.constant 0.000000e+00 : f32
    %19 = vector.broadcast %cst_16 : f32 to vector<80x64xf32>
    %20 = arith.maximumf %18, %19 : vector<80x64xf32>
    %cst_17 = arith.constant dense<0.000000e+00> : vector<5x64xf32>
    %21 = tpu.matmul %3, %20, %cst_17 {dimension_numbers = #tpu.dot_dimension_numbers<[1], [0], [0], [1], [0, 0, 1, 1], [], []>} : vector<5x80xf32>, vector<80x64xf32>, vector<5x64xf32> -> vector<5x64xf32>
    %22 = vector.broadcast %4 : vector<5x1xf32> to vector<5x64xf32>
    %23 = arith.addf %21, %22 : vector<5x64xf32>
    %c0_18 = arith.constant 0 : index
    %c0_19 = arith.constant 0 : index
    %c0_20 = arith.constant 0 : index
    %c0_21 = arith.constant 0 : index
    %24 = vector.load %arg4[%c0_18, %c0_19, %c0_20, %c0_21] : memref<1x8x5x64xf32, #tpu.memory_space<vmem>>, vector<1x1x5x64xf32>
    %25 = vector.shape_cast %24 : vector<1x1x5x64xf32> to vector<5x64xf32>
    %26 = vector.shape_cast %23 : vector<5x64xf32> to vector<1x1x5x64xf32>
    tpu.vector_store %arg4[%c0_18, %c0_19, %c0_20, %c0_21], %26 {strides = array<i32>} : memref<1x8x5x64xf32, #tpu.memory_space<vmem>>, vector<1x1x5x64xf32>,
    %27 = vector.extract_strided_slice %23 {offsets = [0, 0], sizes = [1, 64], strides = [1, 1]} : vector<5x64xf32> to vector<1x64xf32>
    %28 = vector.extract_strided_slice %23 {offsets = [1, 0], sizes = [1, 64], strides = [1, 1]} : vector<5x64xf32> to vector<1x64xf32>
    %29 = arith.maximumf %27, %28 : vector<1x64xf32>
    %30 = vector.extract_strided_slice %23 {offsets = [2, 0], sizes = [1, 64], strides = [1, 1]} : vector<5x64xf32> to vector<1x64xf32>
    %31 = vector.extract_strided_slice %23 {offsets = [3, 0], sizes = [1, 64], strides = [1, 1]} : vector<5x64xf32> to vector<1x64xf32>
    %32 = arith.maximumf %30, %31 : vector<1x64xf32>
    %33 = vector.extract_strided_slice %23 {offsets = [4, 0], sizes = [1, 64], strides = [1, 1]} : vector<5x64xf32> to vector<1x64xf32>
    %34 = arith.maximumf %32, %33 : vector<1x64xf32>
    %35 = arith.maximumf %29, %34 : vector<1x64xf32>
    %36 = vector.broadcast %35 : vector<1x64xf32> to vector<5x64xf32>
    %37 = arith.subf %23, %36 : vector<5x64xf32>
    %38 = math.exp %37 : vector<5x64xf32>
    %39 = vector.extract_strided_slice %38 {offsets = [0, 0], sizes = [1, 64], strides = [1, 1]} : vector<5x64xf32> to vector<1x64xf32>
    %40 = vector.extract_strided_slice %38 {offsets = [1, 0], sizes = [1, 64], strides = [1, 1]} : vector<5x64xf32> to vector<1x64xf32>
    %41 = arith.addf %39, %40 : vector<1x64xf32>
    %42 = vector.extract_strided_slice %38 {offsets = [2, 0], sizes = [1, 64], strides = [1, 1]} : vector<5x64xf32> to vector<1x64xf32>
    %43 = arith.addf %41, %42 : vector<1x64xf32>
    %44 = vector.extract_strided_slice %38 {offsets = [3, 0], sizes = [1, 64], strides = [1, 1]} : vector<5x64xf32> to vector<1x64xf32>
    %45 = arith.addf %43, %44 : vector<1x64xf32>
    %46 = vector.extract_strided_slice %38 {offsets = [4, 0], sizes = [1, 64], strides = [1, 1]} : vector<5x64xf32> to vector<1x64xf32>
    %47 = arith.addf %45, %46 : vector<1x64xf32>
    %cst_22 = arith.constant dense<0.000000e+00> : vector<3x64xf32>
    %48 = tpu.matmul %5, %38, %cst_22 {dimension_numbers = #tpu.dot_dimension_numbers<[1], [0], [0], [1], [0, 0, 1, 1], [], []>} : vector<3x5xf32>, vector<5x64xf32>, vector<3x64xf32> -> vector<3x64xf32>
    %cst_23 = arith.constant 1.000000e+00 : f32
    %49 = vector.broadcast %cst_23 : f32 to vector<1x64xf32>
    %50 = arith.divf %49, %47 : vector<1x64xf32>
    %51 = vector.broadcast %50 : vector<1x64xf32> to vector<3x64xf32>
    %52 = arith.mulf %48, %51 : vector<3x64xf32>
    %53 = vector.broadcast %6 : vector<3x1xf32> to vector<3x64xf32>
    %54 = arith.addf %52, %53 : vector<3x64xf32>
    %cst_24 = arith.constant 0.000000e+00 : f32
    %55 = vector.broadcast %cst_24 : f32 to vector<3x64xf32>
    %56 = arith.maximumf %54, %55 : vector<3x64xf32>
    %cst_25 = arith.constant dense<0.000000e+00> : vector<3x2xf32>
    %57 = tpu.matmul %56, %10, %cst_25 {dimension_numbers = #tpu.dot_dimension_numbers<[1], [0], [0], [1], [0, 0, 1, 1], [], []>} : vector<3x64xf32>, vector<64x2xf32>, vector<3x2xf32> -> vector<3x2xf32>
    %58 = vector.broadcast %7 : vector<3x1xf32> to vector<3x2xf32>
    %59 = arith.mulf %57, %58 : vector<3x2xf32>
    %60 = vector.extract_strided_slice %59 {offsets = [0, 0], sizes = [1, 2], strides = [1, 1]} : vector<3x2xf32> to vector<1x2xf32>
    %61 = vector.extract_strided_slice %59 {offsets = [1, 0], sizes = [1, 2], strides = [1, 1]} : vector<3x2xf32> to vector<1x2xf32>
    %62 = arith.addf %60, %61 : vector<1x2xf32>
    %63 = vector.extract_strided_slice %59 {offsets = [2, 0], sizes = [1, 2], strides = [1, 1]} : vector<3x2xf32> to vector<1x2xf32>
    %64 = arith.addf %62, %63 : vector<1x2xf32>
    %65 = vector.broadcast %8 : vector<1x1xf32> to vector<1x2xf32>
    %66 = arith.addf %64, %65 : vector<1x2xf32>
    %c9_26 = arith.constant 9 : index
    %c0_27 = arith.constant 0 : index
    %67 = vector.load %arg1[%c9_26, %c0_27] : memref<16x64xf32, #tpu.memory_space<vmem>>, vector<1x64xf32>
    %68 = vector.broadcast %1 : vector<80x1xf32> to vector<80x64xf32>
    %69 = vector.broadcast %67 : vector<1x64xf32> to vector<80x64xf32>
    %70 = arith.mulf %68, %69 : vector<80x64xf32>
    %71 = arith.addf %11, %70 : vector<80x64xf32>
    %72 = vector.broadcast %2 : vector<80x1xf32> to vector<80x64xf32>
    %73 = arith.addf %71, %72 : vector<80x64xf32>
    %cst_28 = arith.constant 0.000000e+00 : f32
    %74 = vector.broadcast %cst_28 : f32 to vector<80x64xf32>
    %75 = arith.maximumf %73, %74 : vector<80x64xf32>
    %cst_29 = arith.constant dense<0.000000e+00> : vector<5x64xf32>
    %76 = tpu.matmul %3, %75, %cst_29 {dimension_numbers = #tpu.dot_dimension_numbers<[1], [0], [0], [1], [0, 0, 1, 1], [], []>} : vector<5x80xf32>, vector<80x64xf32>, vector<5x64xf32> -> vector<5x64xf32>
    %77 = vector.broadcast %4 : vector<5x1xf32> to vector<5x64xf32>
    %78 = arith.addf %76, %77 : vector<5x64xf32>
    %c0_30 = arith.constant 0 : index
    %c1 = arith.constant 1 : index
    %c0_31 = arith.constant 0 : index
    %c0_32 = arith.constant 0 : index
    %79 = vector.load %arg4[%c0_30, %c1, %c0_31, %c0_32] : memref<1x8x5x64xf32, #tpu.memory_space<vmem>>, vector<1x1x5x64xf32>
    %80 = vector.shape_cast %79 : vector<1x1x5x64xf32> to vector<5x64xf32>
    %81 = vector.shape_cast %78 : vector<5x64xf32> to vector<1x1x5x64xf32>
    tpu.vector_store %arg4[%c0_30, %c1, %c0_31, %c0_32], %81 {strides = array<i32>} : memref<1x8x5x64xf32, #tpu.memory_space<vmem>>, vector<1x1x5x64xf32>,
    %82 = vector.extract_strided_slice %78 {offsets = [0, 0], sizes = [1, 64], strides = [1, 1]} : vector<5x64xf32> to vector<1x64xf32>
    %83 = vector.extract_strided_slice %78 {offsets = [1, 0], sizes = [1, 64], strides = [1, 1]} : vector<5x64xf32> to vector<1x64xf32>
    %84 = arith.maximumf %82, %83 : vector<1x64xf32>
    %85 = vector.extract_strided_slice %78 {offsets = [2, 0], sizes = [1, 64], strides = [1, 1]} : vector<5x64xf32> to vector<1x64xf32>
    %86 = vector.extract_strided_slice %78 {offsets = [3, 0], sizes = [1, 64], strides = [1, 1]} : vector<5x64xf32> to vector<1x64xf32>
    %87 = arith.maximumf %85, %86 : vector<1x64xf32>
    %88 = vector.extract_strided_slice %78 {offsets = [4, 0], sizes = [1, 64], strides = [1, 1]} : vector<5x64xf32> to vector<1x64xf32>
    %89 = arith.maximumf %87, %88 : vector<1x64xf32>
    %90 = arith.maximumf %84, %89 : vector<1x64xf32>
    %91 = vector.broadcast %90 : vector<1x64xf32> to vector<5x64xf32>
    %92 = arith.subf %78, %91 : vector<5x64xf32>
    %93 = math.exp %92 : vector<5x64xf32>
    %94 = vector.extract_strided_slice %93 {offsets = [0, 0], sizes = [1, 64], strides = [1, 1]} : vector<5x64xf32> to vector<1x64xf32>
    %95 = vector.extract_strided_slice %93 {offsets = [1, 0], sizes = [1, 64], strides = [1, 1]} : vector<5x64xf32> to vector<1x64xf32>
    %96 = arith.addf %94, %95 : vector<1x64xf32>
    %97 = vector.extract_strided_slice %93 {offsets = [2, 0], sizes = [1, 64], strides = [1, 1]} : vector<5x64xf32> to vector<1x64xf32>
    %98 = arith.addf %96, %97 : vector<1x64xf32>
    %99 = vector.extract_strided_slice %93 {offsets = [3, 0], sizes = [1, 64], strides = [1, 1]} : vector<5x64xf32> to vector<1x64xf32>
    %100 = arith.addf %98, %99 : vector<1x64xf32>
    %101 = vector.extract_strided_slice %93 {offsets = [4, 0], sizes = [1, 64], strides = [1, 1]} : vector<5x64xf32> to vector<1x64xf32>
    %102 = arith.addf %100, %101 : vector<1x64xf32>
    %cst_33 = arith.constant dense<0.000000e+00> : vector<3x64xf32>
    %103 = tpu.matmul %5, %93, %cst_33 {dimension_numbers = #tpu.dot_dimension_numbers<[1], [0], [0], [1], [0, 0, 1, 1], [], []>} : vector<3x5xf32>, vector<5x64xf32>, vector<3x64xf32> -> vector<3x64xf32>
    %cst_34 = arith.constant 1.000000e+00 : f32
    %104 = vector.broadcast %cst_34 : f32 to vector<1x64xf32>
    %105 = arith.divf %104, %102 : vector<1x64xf32>
    %106 = vector.broadcast %105 : vector<1x64xf32> to vector<3x64xf32>
    %107 = arith.mulf %103, %106 : vector<3x64xf32>
    %108 = vector.broadcast %6 : vector<3x1xf32> to vector<3x64xf32>
    %109 = arith.addf %107, %108 : vector<3x64xf32>
    %cst_35 = arith.constant 0.000000e+00 : f32
    %110 = vector.broadcast %cst_35 : f32 to vector<3x64xf32>
    %111 = arith.maximumf %109, %110 : vector<3x64xf32>
    %cst_36 = arith.constant dense<0.000000e+00> : vector<3x2xf32>
    %112 = tpu.matmul %111, %10, %cst_36 {dimension_numbers = #tpu.dot_dimension_numbers<[1], [0], [0], [1], [0, 0, 1, 1], [], []>} : vector<3x64xf32>, vector<64x2xf32>, vector<3x2xf32> -> vector<3x2xf32>
    %113 = vector.broadcast %7 : vector<3x1xf32> to vector<3x2xf32>
    %114 = arith.mulf %112, %113 : vector<3x2xf32>
    %115 = vector.extract_strided_slice %114 {offsets = [0, 0], sizes = [1, 2], strides = [1, 1]} : vector<3x2xf32> to vector<1x2xf32>
    %116 = vector.extract_strided_slice %114 {offsets = [1, 0], sizes = [1, 2], strides = [1, 1]} : vector<3x2xf32> to vector<1x2xf32>
    %117 = arith.addf %115, %116 : vector<1x2xf32>
    %118 = vector.extract_strided_slice %114 {offsets = [2, 0], sizes = [1, 2], strides = [1, 1]} : vector<3x2xf32> to vector<1x2xf32>
    %119 = arith.addf %117, %118 : vector<1x2xf32>
    %120 = vector.broadcast %8 : vector<1x1xf32> to vector<1x2xf32>
    %121 = arith.addf %119, %120 : vector<1x2xf32>
    %c10 = arith.constant 10 : index
    %c0_37 = arith.constant 0 : index
    %122 = vector.load %arg1[%c10, %c0_37] : memref<16x64xf32, #tpu.memory_space<vmem>>, vector<1x64xf32>
    %123 = vector.broadcast %1 : vector<80x1xf32> to vector<80x64xf32>
    %124 = vector.broadcast %122 : vector<1x64xf32> to vector<80x64xf32>
    %125 = arith.mulf %123, %124 : vector<80x64xf32>
    %126 = arith.addf %11, %125 : vector<80x64xf32>
    %127 = vector.broadcast %2 : vector<80x1xf32> to vector<80x64xf32>
    %128 = arith.addf %126, %127 : vector<80x64xf32>
    %cst_38 = arith.constant 0.000000e+00 : f32
    %129 = vector.broadcast %cst_38 : f32 to vector<80x64xf32>
    %130 = arith.maximumf %128, %129 : vector<80x64xf32>
    %cst_39 = arith.constant dense<0.000000e+00> : vector<5x64xf32>
    %131 = tpu.matmul %3, %130, %cst_39 {dimension_numbers = #tpu.dot_dimension_numbers<[1], [0], [0], [1], [0, 0, 1, 1], [], []>} : vector<5x80xf32>, vector<80x64xf32>, vector<5x64xf32> -> vector<5x64xf32>
    %132 = vector.broadcast %4 : vector<5x1xf32> to vector<5x64xf32>
    %133 = arith.addf %131, %132 : vector<5x64xf32>
    %c0_40 = arith.constant 0 : index
    %c2 = arith.constant 2 : index
    %c0_41 = arith.constant 0 : index
    %c0_42 = arith.constant 0 : index
    %134 = vector.load %arg4[%c0_40, %c2, %c0_41, %c0_42] : memref<1x8x5x64xf32, #tpu.memory_space<vmem>>, vector<1x1x5x64xf32>
    %135 = vector.shape_cast %134 : vector<1x1x5x64xf32> to vector<5x64xf32>
    %136 = vector.shape_cast %133 : vector<5x64xf32> to vector<1x1x5x64xf32>
    tpu.vector_store %arg4[%c0_40, %c2, %c0_41, %c0_42], %136 {strides = array<i32>} : memref<1x8x5x64xf32, #tpu.memory_space<vmem>>, vector<1x1x5x64xf32>,
    %137 = vector.extract_strided_slice %133 {offsets = [0, 0], sizes = [1, 64], strides = [1, 1]} : vector<5x64xf32> to vector<1x64xf32>
    %138 = vector.extract_strided_slice %133 {offsets = [1, 0], sizes = [1, 64], strides = [1, 1]} : vector<5x64xf32> to vector<1x64xf32>
    %139 = arith.maximumf %137, %138 : vector<1x64xf32>
    %140 = vector.extract_strided_slice %133 {offsets = [2, 0], sizes = [1, 64], strides = [1, 1]} : vector<5x64xf32> to vector<1x64xf32>
    %141 = vector.extract_strided_slice %133 {offsets = [3, 0], sizes = [1, 64], strides = [1, 1]} : vector<5x64xf32> to vector<1x64xf32>
    %142 = arith.maximumf %140, %141 : vector<1x64xf32>
    %143 = vector.extract_strided_slice %133 {offsets = [4, 0], sizes = [1, 64], strides = [1, 1]} : vector<5x64xf32> to vector<1x64xf32>
    %144 = arith.maximumf %142, %143 : vector<1x64xf32>
    %145 = arith.maximumf %139, %144 : vector<1x64xf32>
    %146 = vector.broadcast %145 : vector<1x64xf32> to vector<5x64xf32>
    %147 = arith.subf %133, %146 : vector<5x64xf32>
    %148 = math.exp %147 : vector<5x64xf32>
    %149 = vector.extract_strided_slice %148 {offsets = [0, 0], sizes = [1, 64], strides = [1, 1]} : vector<5x64xf32> to vector<1x64xf32>
    %150 = vector.extract_strided_slice %148 {offsets = [1, 0], sizes = [1, 64], strides = [1, 1]} : vector<5x64xf32> to vector<1x64xf32>
    %151 = arith.addf %149, %150 : vector<1x64xf32>
    %152 = vector.extract_strided_slice %148 {offsets = [2, 0], sizes = [1, 64], strides = [1, 1]} : vector<5x64xf32> to vector<1x64xf32>
    %153 = arith.addf %151, %152 : vector<1x64xf32>
    %154 = vector.extract_strided_slice %148 {offsets = [3, 0], sizes = [1, 64], strides = [1, 1]} : vector<5x64xf32> to vector<1x64xf32>
    %155 = arith.addf %153, %154 : vector<1x64xf32>
    %156 = vector.extract_strided_slice %148 {offsets = [4, 0], sizes = [1, 64], strides = [1, 1]} : vector<5x64xf32> to vector<1x64xf32>
    %157 = arith.addf %155, %156 : vector<1x64xf32>
    %cst_43 = arith.constant dense<0.000000e+00> : vector<3x64xf32>
    %158 = tpu.matmul %5, %148, %cst_43 {dimension_numbers = #tpu.dot_dimension_numbers<[1], [0], [0], [1], [0, 0, 1, 1], [], []>} : vector<3x5xf32>, vector<5x64xf32>, vector<3x64xf32> -> vector<3x64xf32>
    %cst_44 = arith.constant 1.000000e+00 : f32
    %159 = vector.broadcast %cst_44 : f32 to vector<1x64xf32>
    %160 = arith.divf %159, %157 : vector<1x64xf32>
    %161 = vector.broadcast %160 : vector<1x64xf32> to vector<3x64xf32>
    %162 = arith.mulf %158, %161 : vector<3x64xf32>
    %163 = vector.broadcast %6 : vector<3x1xf32> to vector<3x64xf32>
    %164 = arith.addf %162, %163 : vector<3x64xf32>
    %cst_45 = arith.constant 0.000000e+00 : f32
    %165 = vector.broadcast %cst_45 : f32 to vector<3x64xf32>
    %166 = arith.maximumf %164, %165 : vector<3x64xf32>
    %cst_46 = arith.constant dense<0.000000e+00> : vector<3x2xf32>
    %167 = tpu.matmul %166, %10, %cst_46 {dimension_numbers = #tpu.dot_dimension_numbers<[1], [0], [0], [1], [0, 0, 1, 1], [], []>} : vector<3x64xf32>, vector<64x2xf32>, vector<3x2xf32> -> vector<3x2xf32>
    %168 = vector.broadcast %7 : vector<3x1xf32> to vector<3x2xf32>
    %169 = arith.mulf %167, %168 : vector<3x2xf32>
    %170 = vector.extract_strided_slice %169 {offsets = [0, 0], sizes = [1, 2], strides = [1, 1]} : vector<3x2xf32> to vector<1x2xf32>
    %171 = vector.extract_strided_slice %169 {offsets = [1, 0], sizes = [1, 2], strides = [1, 1]} : vector<3x2xf32> to vector<1x2xf32>
    %172 = arith.addf %170, %171 : vector<1x2xf32>
    %173 = vector.extract_strided_slice %169 {offsets = [2, 0], sizes = [1, 2], strides = [1, 1]} : vector<3x2xf32> to vector<1x2xf32>
    %174 = arith.addf %172, %173 : vector<1x2xf32>
    %175 = vector.broadcast %8 : vector<1x1xf32> to vector<1x2xf32>
    %176 = arith.addf %174, %175 : vector<1x2xf32>
    %c11 = arith.constant 11 : index
    %c0_47 = arith.constant 0 : index
    %177 = vector.load %arg1[%c11, %c0_47] : memref<16x64xf32, #tpu.memory_space<vmem>>, vector<1x64xf32>
    %178 = vector.broadcast %1 : vector<80x1xf32> to vector<80x64xf32>
    %179 = vector.broadcast %177 : vector<1x64xf32> to vector<80x64xf32>
    %180 = arith.mulf %178, %179 : vector<80x64xf32>
    %181 = arith.addf %11, %180 : vector<80x64xf32>
    %182 = vector.broadcast %2 : vector<80x1xf32> to vector<80x64xf32>
    %183 = arith.addf %181, %182 : vector<80x64xf32>
    %cst_48 = arith.constant 0.000000e+00 : f32
    %184 = vector.broadcast %cst_48 : f32 to vector<80x64xf32>
    %185 = arith.maximumf %183, %184 : vector<80x64xf32>
    %cst_49 = arith.constant dense<0.000000e+00> : vector<5x64xf32>
    %186 = tpu.matmul %3, %185, %cst_49 {dimension_numbers = #tpu.dot_dimension_numbers<[1], [0], [0], [1], [0, 0, 1, 1], [], []>} : vector<5x80xf32>, vector<80x64xf32>, vector<5x64xf32> -> vector<5x64xf32>
    %187 = vector.broadcast %4 : vector<5x1xf32> to vector<5x64xf32>
    %188 = arith.addf %186, %187 : vector<5x64xf32>
    %c0_50 = arith.constant 0 : index
    %c3 = arith.constant 3 : index
    %c0_51 = arith.constant 0 : index
    %c0_52 = arith.constant 0 : index
    %189 = vector.load %arg4[%c0_50, %c3, %c0_51, %c0_52] : memref<1x8x5x64xf32, #tpu.memory_space<vmem>>, vector<1x1x5x64xf32>
    %190 = vector.shape_cast %189 : vector<1x1x5x64xf32> to vector<5x64xf32>
    %191 = vector.shape_cast %188 : vector<5x64xf32> to vector<1x1x5x64xf32>
    tpu.vector_store %arg4[%c0_50, %c3, %c0_51, %c0_52], %191 {strides = array<i32>} : memref<1x8x5x64xf32, #tpu.memory_space<vmem>>, vector<1x1x5x64xf32>,
    %192 = vector.extract_strided_slice %188 {offsets = [0, 0], sizes = [1, 64], strides = [1, 1]} : vector<5x64xf32> to vector<1x64xf32>
    %193 = vector.extract_strided_slice %188 {offsets = [1, 0], sizes = [1, 64], strides = [1, 1]} : vector<5x64xf32> to vector<1x64xf32>
    %194 = arith.maximumf %192, %193 : vector<1x64xf32>
    %195 = vector.extract_strided_slice %188 {offsets = [2, 0], sizes = [1, 64], strides = [1, 1]} : vector<5x64xf32> to vector<1x64xf32>
    %196 = vector.extract_strided_slice %188 {offsets = [3, 0], sizes = [1, 64], strides = [1, 1]} : vector<5x64xf32> to vector<1x64xf32>
    %197 = arith.maximumf %195, %196 : vector<1x64xf32>
    %198 = vector.extract_strided_slice %188 {offsets = [4, 0], sizes = [1, 64], strides = [1, 1]} : vector<5x64xf32> to vector<1x64xf32>
    %199 = arith.maximumf %197, %198 : vector<1x64xf32>
    %200 = arith.maximumf %194, %199 : vector<1x64xf32>
    %201 = vector.broadcast %200 : vector<1x64xf32> to vector<5x64xf32>
    %202 = arith.subf %188, %201 : vector<5x64xf32>
    %203 = math.exp %202 : vector<5x64xf32>
    %204 = vector.extract_strided_slice %203 {offsets = [0, 0], sizes = [1, 64], strides = [1, 1]} : vector<5x64xf32> to vector<1x64xf32>
    %205 = vector.extract_strided_slice %203 {offsets = [1, 0], sizes = [1, 64], strides = [1, 1]} : vector<5x64xf32> to vector<1x64xf32>
    %206 = arith.addf %204, %205 : vector<1x64xf32>
    %207 = vector.extract_strided_slice %203 {offsets = [2, 0], sizes = [1, 64], strides = [1, 1]} : vector<5x64xf32> to vector<1x64xf32>
    %208 = arith.addf %206, %207 : vector<1x64xf32>
    %209 = vector.extract_strided_slice %203 {offsets = [3, 0], sizes = [1, 64], strides = [1, 1]} : vector<5x64xf32> to vector<1x64xf32>
    %210 = arith.addf %208, %209 : vector<1x64xf32>
    %211 = vector.extract_strided_slice %203 {offsets = [4, 0], sizes = [1, 64], strides = [1, 1]} : vector<5x64xf32> to vector<1x64xf32>
    %212 = arith.addf %210, %211 : vector<1x64xf32>
    %cst_53 = arith.constant dense<0.000000e+00> : vector<3x64xf32>
    %213 = tpu.matmul %5, %203, %cst_53 {dimension_numbers = #tpu.dot_dimension_numbers<[1], [0], [0], [1], [0, 0, 1, 1], [], []>} : vector<3x5xf32>, vector<5x64xf32>, vector<3x64xf32> -> vector<3x64xf32>
    %cst_54 = arith.constant 1.000000e+00 : f32
    %214 = vector.broadcast %cst_54 : f32 to vector<1x64xf32>
    %215 = arith.divf %214, %212 : vector<1x64xf32>
    %216 = vector.broadcast %215 : vector<1x64xf32> to vector<3x64xf32>
    %217 = arith.mulf %213, %216 : vector<3x64xf32>
    %218 = vector.broadcast %6 : vector<3x1xf32> to vector<3x64xf32>
    %219 = arith.addf %217, %218 : vector<3x64xf32>
    %cst_55 = arith.constant 0.000000e+00 : f32
    %220 = vector.broadcast %cst_55 : f32 to vector<3x64xf32>
    %221 = arith.maximumf %219, %220 : vector<3x64xf32>
    %cst_56 = arith.constant dense<0.000000e+00> : vector<3x2xf32>
    %222 = tpu.matmul %221, %10, %cst_56 {dimension_numbers = #tpu.dot_dimension_numbers<[1], [0], [0], [1], [0, 0, 1, 1], [], []>} : vector<3x64xf32>, vector<64x2xf32>, vector<3x2xf32> -> vector<3x2xf32>
    %223 = vector.broadcast %7 : vector<3x1xf32> to vector<3x2xf32>
    %224 = arith.mulf %222, %223 : vector<3x2xf32>
    %225 = vector.extract_strided_slice %224 {offsets = [0, 0], sizes = [1, 2], strides = [1, 1]} : vector<3x2xf32> to vector<1x2xf32>
    %226 = vector.extract_strided_slice %224 {offsets = [1, 0], sizes = [1, 2], strides = [1, 1]} : vector<3x2xf32> to vector<1x2xf32>
    %227 = arith.addf %225, %226 : vector<1x2xf32>
    %228 = vector.extract_strided_slice %224 {offsets = [2, 0], sizes = [1, 2], strides = [1, 1]} : vector<3x2xf32> to vector<1x2xf32>
    %229 = arith.addf %227, %228 : vector<1x2xf32>
    %230 = vector.broadcast %8 : vector<1x1xf32> to vector<1x2xf32>
    %231 = arith.addf %229, %230 : vector<1x2xf32>
    %c12 = arith.constant 12 : index
    %c0_57 = arith.constant 0 : index
    %232 = vector.load %arg1[%c12, %c0_57] : memref<16x64xf32, #tpu.memory_space<vmem>>, vector<1x64xf32>
    %233 = vector.broadcast %1 : vector<80x1xf32> to vector<80x64xf32>
    %234 = vector.broadcast %232 : vector<1x64xf32> to vector<80x64xf32>
    %235 = arith.mulf %233, %234 : vector<80x64xf32>
    %236 = arith.addf %11, %235 : vector<80x64xf32>
    %237 = vector.broadcast %2 : vector<80x1xf32> to vector<80x64xf32>
    %238 = arith.addf %236, %237 : vector<80x64xf32>
    %cst_58 = arith.constant 0.000000e+00 : f32
    %239 = vector.broadcast %cst_58 : f32 to vector<80x64xf32>
    %240 = arith.maximumf %238, %239 : vector<80x64xf32>
    %cst_59 = arith.constant dense<0.000000e+00> : vector<5x64xf32>
    %241 = tpu.matmul %3, %240, %cst_59 {dimension_numbers = #tpu.dot_dimension_numbers<[1], [0], [0], [1], [0, 0, 1, 1], [], []>} : vector<5x80xf32>, vector<80x64xf32>, vector<5x64xf32> -> vector<5x64xf32>
    %242 = vector.broadcast %4 : vector<5x1xf32> to vector<5x64xf32>
    %243 = arith.addf %241, %242 : vector<5x64xf32>
    %c0_60 = arith.constant 0 : index
    %c4 = arith.constant 4 : index
    %c0_61 = arith.constant 0 : index
    %c0_62 = arith.constant 0 : index
    %244 = vector.load %arg4[%c0_60, %c4, %c0_61, %c0_62] : memref<1x8x5x64xf32, #tpu.memory_space<vmem>>, vector<1x1x5x64xf32>
    %245 = vector.shape_cast %244 : vector<1x1x5x64xf32> to vector<5x64xf32>
    %246 = vector.shape_cast %243 : vector<5x64xf32> to vector<1x1x5x64xf32>
    tpu.vector_store %arg4[%c0_60, %c4, %c0_61, %c0_62], %246 {strides = array<i32>} : memref<1x8x5x64xf32, #tpu.memory_space<vmem>>, vector<1x1x5x64xf32>,
    %247 = vector.extract_strided_slice %243 {offsets = [0, 0], sizes = [1, 64], strides = [1, 1]} : vector<5x64xf32> to vector<1x64xf32>
    %248 = vector.extract_strided_slice %243 {offsets = [1, 0], sizes = [1, 64], strides = [1, 1]} : vector<5x64xf32> to vector<1x64xf32>
    %249 = arith.maximumf %247, %248 : vector<1x64xf32>
    %250 = vector.extract_strided_slice %243 {offsets = [2, 0], sizes = [1, 64], strides = [1, 1]} : vector<5x64xf32> to vector<1x64xf32>
    %251 = vector.extract_strided_slice %243 {offsets = [3, 0], sizes = [1, 64], strides = [1, 1]} : vector<5x64xf32> to vector<1x64xf32>
    %252 = arith.maximumf %250, %251 : vector<1x64xf32>
    %253 = vector.extract_strided_slice %243 {offsets = [4, 0], sizes = [1, 64], strides = [1, 1]} : vector<5x64xf32> to vector<1x64xf32>
    %254 = arith.maximumf %252, %253 : vector<1x64xf32>
    %255 = arith.maximumf %249, %254 : vector<1x64xf32>
    %256 = vector.broadcast %255 : vector<1x64xf32> to vector<5x64xf32>
    %257 = arith.subf %243, %256 : vector<5x64xf32>
    %258 = math.exp %257 : vector<5x64xf32>
    %259 = vector.extract_strided_slice %258 {offsets = [0, 0], sizes = [1, 64], strides = [1, 1]} : vector<5x64xf32> to vector<1x64xf32>
    %260 = vector.extract_strided_slice %258 {offsets = [1, 0], sizes = [1, 64], strides = [1, 1]} : vector<5x64xf32> to vector<1x64xf32>
    %261 = arith.addf %259, %260 : vector<1x64xf32>
    %262 = vector.extract_strided_slice %258 {offsets = [2, 0], sizes = [1, 64], strides = [1, 1]} : vector<5x64xf32> to vector<1x64xf32>
    %263 = arith.addf %261, %262 : vector<1x64xf32>
    %264 = vector.extract_strided_slice %258 {offsets = [3, 0], sizes = [1, 64], strides = [1, 1]} : vector<5x64xf32> to vector<1x64xf32>
    %265 = arith.addf %263, %264 : vector<1x64xf32>
    %266 = vector.extract_strided_slice %258 {offsets = [4, 0], sizes = [1, 64], strides = [1, 1]} : vector<5x64xf32> to vector<1x64xf32>
    %267 = arith.addf %265, %266 : vector<1x64xf32>
    %cst_63 = arith.constant dense<0.000000e+00> : vector<3x64xf32>
    %268 = tpu.matmul %5, %258, %cst_63 {dimension_numbers = #tpu.dot_dimension_numbers<[1], [0], [0], [1], [0, 0, 1, 1], [], []>} : vector<3x5xf32>, vector<5x64xf32>, vector<3x64xf32> -> vector<3x64xf32>
    %cst_64 = arith.constant 1.000000e+00 : f32
    %269 = vector.broadcast %cst_64 : f32 to vector<1x64xf32>
    %270 = arith.divf %269, %267 : vector<1x64xf32>
    %271 = vector.broadcast %270 : vector<1x64xf32> to vector<3x64xf32>
    %272 = arith.mulf %268, %271 : vector<3x64xf32>
    %273 = vector.broadcast %6 : vector<3x1xf32> to vector<3x64xf32>
    %274 = arith.addf %272, %273 : vector<3x64xf32>
    %cst_65 = arith.constant 0.000000e+00 : f32
    %275 = vector.broadcast %cst_65 : f32 to vector<3x64xf32>
    %276 = arith.maximumf %274, %275 : vector<3x64xf32>
    %cst_66 = arith.constant dense<0.000000e+00> : vector<3x2xf32>
    %277 = tpu.matmul %276, %10, %cst_66 {dimension_numbers = #tpu.dot_dimension_numbers<[1], [0], [0], [1], [0, 0, 1, 1], [], []>} : vector<3x64xf32>, vector<64x2xf32>, vector<3x2xf32> -> vector<3x2xf32>
    %278 = vector.broadcast %7 : vector<3x1xf32> to vector<3x2xf32>
    %279 = arith.mulf %277, %278 : vector<3x2xf32>
    %280 = vector.extract_strided_slice %279 {offsets = [0, 0], sizes = [1, 2], strides = [1, 1]} : vector<3x2xf32> to vector<1x2xf32>
    %281 = vector.extract_strided_slice %279 {offsets = [1, 0], sizes = [1, 2], strides = [1, 1]} : vector<3x2xf32> to vector<1x2xf32>
    %282 = arith.addf %280, %281 : vector<1x2xf32>
    %283 = vector.extract_strided_slice %279 {offsets = [2, 0], sizes = [1, 2], strides = [1, 1]} : vector<3x2xf32> to vector<1x2xf32>
    %284 = arith.addf %282, %283 : vector<1x2xf32>
    %285 = vector.broadcast %8 : vector<1x1xf32> to vector<1x2xf32>
    %286 = arith.addf %284, %285 : vector<1x2xf32>
    %c13 = arith.constant 13 : index
    %c0_67 = arith.constant 0 : index
    %287 = vector.load %arg1[%c13, %c0_67] : memref<16x64xf32, #tpu.memory_space<vmem>>, vector<1x64xf32>
    %288 = vector.broadcast %1 : vector<80x1xf32> to vector<80x64xf32>
    %289 = vector.broadcast %287 : vector<1x64xf32> to vector<80x64xf32>
    %290 = arith.mulf %288, %289 : vector<80x64xf32>
    %291 = arith.addf %11, %290 : vector<80x64xf32>
    %292 = vector.broadcast %2 : vector<80x1xf32> to vector<80x64xf32>
    %293 = arith.addf %291, %292 : vector<80x64xf32>
    %cst_68 = arith.constant 0.000000e+00 : f32
    %294 = vector.broadcast %cst_68 : f32 to vector<80x64xf32>
    %295 = arith.maximumf %293, %294 : vector<80x64xf32>
    %cst_69 = arith.constant dense<0.000000e+00> : vector<5x64xf32>
    %296 = tpu.matmul %3, %295, %cst_69 {dimension_numbers = #tpu.dot_dimension_numbers<[1], [0], [0], [1], [0, 0, 1, 1], [], []>} : vector<5x80xf32>, vector<80x64xf32>, vector<5x64xf32> -> vector<5x64xf32>
    %297 = vector.broadcast %4 : vector<5x1xf32> to vector<5x64xf32>
    %298 = arith.addf %296, %297 : vector<5x64xf32>
    %c0_70 = arith.constant 0 : index
    %c5_71 = arith.constant 5 : index
    %c0_72 = arith.constant 0 : index
    %c0_73 = arith.constant 0 : index
    %299 = vector.load %arg4[%c0_70, %c5_71, %c0_72, %c0_73] : memref<1x8x5x64xf32, #tpu.memory_space<vmem>>, vector<1x1x5x64xf32>
    %300 = vector.shape_cast %299 : vector<1x1x5x64xf32> to vector<5x64xf32>
    %301 = vector.shape_cast %298 : vector<5x64xf32> to vector<1x1x5x64xf32>
    tpu.vector_store %arg4[%c0_70, %c5_71, %c0_72, %c0_73], %301 {strides = array<i32>} : memref<1x8x5x64xf32, #tpu.memory_space<vmem>>, vector<1x1x5x64xf32>,
    %302 = vector.extract_strided_slice %298 {offsets = [0, 0], sizes = [1, 64], strides = [1, 1]} : vector<5x64xf32> to vector<1x64xf32>
    %303 = vector.extract_strided_slice %298 {offsets = [1, 0], sizes = [1, 64], strides = [1, 1]} : vector<5x64xf32> to vector<1x64xf32>
    %304 = arith.maximumf %302, %303 : vector<1x64xf32>
    %305 = vector.extract_strided_slice %298 {offsets = [2, 0], sizes = [1, 64], strides = [1, 1]} : vector<5x64xf32> to vector<1x64xf32>
    %306 = vector.extract_strided_slice %298 {offsets = [3, 0], sizes = [1, 64], strides = [1, 1]} : vector<5x64xf32> to vector<1x64xf32>
    %307 = arith.maximumf %305, %306 : vector<1x64xf32>
    %308 = vector.extract_strided_slice %298 {offsets = [4, 0], sizes = [1, 64], strides = [1, 1]} : vector<5x64xf32> to vector<1x64xf32>
    %309 = arith.maximumf %307, %308 : vector<1x64xf32>
    %310 = arith.maximumf %304, %309 : vector<1x64xf32>
    %311 = vector.broadcast %310 : vector<1x64xf32> to vector<5x64xf32>
    %312 = arith.subf %298, %311 : vector<5x64xf32>
    %313 = math.exp %312 : vector<5x64xf32>
    %314 = vector.extract_strided_slice %313 {offsets = [0, 0], sizes = [1, 64], strides = [1, 1]} : vector<5x64xf32> to vector<1x64xf32>
    %315 = vector.extract_strided_slice %313 {offsets = [1, 0], sizes = [1, 64], strides = [1, 1]} : vector<5x64xf32> to vector<1x64xf32>
    %316 = arith.addf %314, %315 : vector<1x64xf32>
    %317 = vector.extract_strided_slice %313 {offsets = [2, 0], sizes = [1, 64], strides = [1, 1]} : vector<5x64xf32> to vector<1x64xf32>
    %318 = arith.addf %316, %317 : vector<1x64xf32>
    %319 = vector.extract_strided_slice %313 {offsets = [3, 0], sizes = [1, 64], strides = [1, 1]} : vector<5x64xf32> to vector<1x64xf32>
    %320 = arith.addf %318, %319 : vector<1x64xf32>
    %321 = vector.extract_strided_slice %313 {offsets = [4, 0], sizes = [1, 64], strides = [1, 1]} : vector<5x64xf32> to vector<1x64xf32>
    %322 = arith.addf %320, %321 : vector<1x64xf32>
    %cst_74 = arith.constant dense<0.000000e+00> : vector<3x64xf32>
    %323 = tpu.matmul %5, %313, %cst_74 {dimension_numbers = #tpu.dot_dimension_numbers<[1], [0], [0], [1], [0, 0, 1, 1], [], []>} : vector<3x5xf32>, vector<5x64xf32>, vector<3x64xf32> -> vector<3x64xf32>
    %cst_75 = arith.constant 1.000000e+00 : f32
    %324 = vector.broadcast %cst_75 : f32 to vector<1x64xf32>
    %325 = arith.divf %324, %322 : vector<1x64xf32>
    %326 = vector.broadcast %325 : vector<1x64xf32> to vector<3x64xf32>
    %327 = arith.mulf %323, %326 : vector<3x64xf32>
    %328 = vector.broadcast %6 : vector<3x1xf32> to vector<3x64xf32>
    %329 = arith.addf %327, %328 : vector<3x64xf32>
    %cst_76 = arith.constant 0.000000e+00 : f32
    %330 = vector.broadcast %cst_76 : f32 to vector<3x64xf32>
    %331 = arith.maximumf %329, %330 : vector<3x64xf32>
    %cst_77 = arith.constant dense<0.000000e+00> : vector<3x2xf32>
    %332 = tpu.matmul %331, %10, %cst_77 {dimension_numbers = #tpu.dot_dimension_numbers<[1], [0], [0], [1], [0, 0, 1, 1], [], []>} : vector<3x64xf32>, vector<64x2xf32>, vector<3x2xf32> -> vector<3x2xf32>
    %333 = vector.broadcast %7 : vector<3x1xf32> to vector<3x2xf32>
    %334 = arith.mulf %332, %333 : vector<3x2xf32>
    %335 = vector.extract_strided_slice %334 {offsets = [0, 0], sizes = [1, 2], strides = [1, 1]} : vector<3x2xf32> to vector<1x2xf32>
    %336 = vector.extract_strided_slice %334 {offsets = [1, 0], sizes = [1, 2], strides = [1, 1]} : vector<3x2xf32> to vector<1x2xf32>
    %337 = arith.addf %335, %336 : vector<1x2xf32>
    %338 = vector.extract_strided_slice %334 {offsets = [2, 0], sizes = [1, 2], strides = [1, 1]} : vector<3x2xf32> to vector<1x2xf32>
    %339 = arith.addf %337, %338 : vector<1x2xf32>
    %340 = vector.broadcast %8 : vector<1x1xf32> to vector<1x2xf32>
    %341 = arith.addf %339, %340 : vector<1x2xf32>
    %c14 = arith.constant 14 : index
    %c0_78 = arith.constant 0 : index
    %342 = vector.load %arg1[%c14, %c0_78] : memref<16x64xf32, #tpu.memory_space<vmem>>, vector<1x64xf32>
    %343 = vector.broadcast %1 : vector<80x1xf32> to vector<80x64xf32>
    %344 = vector.broadcast %342 : vector<1x64xf32> to vector<80x64xf32>
    %345 = arith.mulf %343, %344 : vector<80x64xf32>
    %346 = arith.addf %11, %345 : vector<80x64xf32>
    %347 = vector.broadcast %2 : vector<80x1xf32> to vector<80x64xf32>
    %348 = arith.addf %346, %347 : vector<80x64xf32>
    %cst_79 = arith.constant 0.000000e+00 : f32
    %349 = vector.broadcast %cst_79 : f32 to vector<80x64xf32>
    %350 = arith.maximumf %348, %349 : vector<80x64xf32>
    %cst_80 = arith.constant dense<0.000000e+00> : vector<5x64xf32>
    %351 = tpu.matmul %3, %350, %cst_80 {dimension_numbers = #tpu.dot_dimension_numbers<[1], [0], [0], [1], [0, 0, 1, 1], [], []>} : vector<5x80xf32>, vector<80x64xf32>, vector<5x64xf32> -> vector<5x64xf32>
    %352 = vector.broadcast %4 : vector<5x1xf32> to vector<5x64xf32>
    %353 = arith.addf %351, %352 : vector<5x64xf32>
    %c0_81 = arith.constant 0 : index
    %c6_82 = arith.constant 6 : index
    %c0_83 = arith.constant 0 : index
    %c0_84 = arith.constant 0 : index
    %354 = vector.load %arg4[%c0_81, %c6_82, %c0_83, %c0_84] : memref<1x8x5x64xf32, #tpu.memory_space<vmem>>, vector<1x1x5x64xf32>
    %355 = vector.shape_cast %354 : vector<1x1x5x64xf32> to vector<5x64xf32>
    %356 = vector.shape_cast %353 : vector<5x64xf32> to vector<1x1x5x64xf32>
    tpu.vector_store %arg4[%c0_81, %c6_82, %c0_83, %c0_84], %356 {strides = array<i32>} : memref<1x8x5x64xf32, #tpu.memory_space<vmem>>, vector<1x1x5x64xf32>,
    %357 = vector.extract_strided_slice %353 {offsets = [0, 0], sizes = [1, 64], strides = [1, 1]} : vector<5x64xf32> to vector<1x64xf32>
    %358 = vector.extract_strided_slice %353 {offsets = [1, 0], sizes = [1, 64], strides = [1, 1]} : vector<5x64xf32> to vector<1x64xf32>
    %359 = arith.maximumf %357, %358 : vector<1x64xf32>
    %360 = vector.extract_strided_slice %353 {offsets = [2, 0], sizes = [1, 64], strides = [1, 1]} : vector<5x64xf32> to vector<1x64xf32>
    %361 = vector.extract_strided_slice %353 {offsets = [3, 0], sizes = [1, 64], strides = [1, 1]} : vector<5x64xf32> to vector<1x64xf32>
    %362 = arith.maximumf %360, %361 : vector<1x64xf32>
    %363 = vector.extract_strided_slice %353 {offsets = [4, 0], sizes = [1, 64], strides = [1, 1]} : vector<5x64xf32> to vector<1x64xf32>
    %364 = arith.maximumf %362, %363 : vector<1x64xf32>
    %365 = arith.maximumf %359, %364 : vector<1x64xf32>
    %366 = vector.broadcast %365 : vector<1x64xf32> to vector<5x64xf32>
    %367 = arith.subf %353, %366 : vector<5x64xf32>
    %368 = math.exp %367 : vector<5x64xf32>
    %369 = vector.extract_strided_slice %368 {offsets = [0, 0], sizes = [1, 64], strides = [1, 1]} : vector<5x64xf32> to vector<1x64xf32>
    %370 = vector.extract_strided_slice %368 {offsets = [1, 0], sizes = [1, 64], strides = [1, 1]} : vector<5x64xf32> to vector<1x64xf32>
    %371 = arith.addf %369, %370 : vector<1x64xf32>
    %372 = vector.extract_strided_slice %368 {offsets = [2, 0], sizes = [1, 64], strides = [1, 1]} : vector<5x64xf32> to vector<1x64xf32>
    %373 = arith.addf %371, %372 : vector<1x64xf32>
    %374 = vector.extract_strided_slice %368 {offsets = [3, 0], sizes = [1, 64], strides = [1, 1]} : vector<5x64xf32> to vector<1x64xf32>
    %375 = arith.addf %373, %374 : vector<1x64xf32>
    %376 = vector.extract_strided_slice %368 {offsets = [4, 0], sizes = [1, 64], strides = [1, 1]} : vector<5x64xf32> to vector<1x64xf32>
    %377 = arith.addf %375, %376 : vector<1x64xf32>
    %cst_85 = arith.constant dense<0.000000e+00> : vector<3x64xf32>
    %378 = tpu.matmul %5, %368, %cst_85 {dimension_numbers = #tpu.dot_dimension_numbers<[1], [0], [0], [1], [0, 0, 1, 1], [], []>} : vector<3x5xf32>, vector<5x64xf32>, vector<3x64xf32> -> vector<3x64xf32>
    %cst_86 = arith.constant 1.000000e+00 : f32
    %379 = vector.broadcast %cst_86 : f32 to vector<1x64xf32>
    %380 = arith.divf %379, %377 : vector<1x64xf32>
    %381 = vector.broadcast %380 : vector<1x64xf32> to vector<3x64xf32>
    %382 = arith.mulf %378, %381 : vector<3x64xf32>
    %383 = vector.broadcast %6 : vector<3x1xf32> to vector<3x64xf32>
    %384 = arith.addf %382, %383 : vector<3x64xf32>
    %cst_87 = arith.constant 0.000000e+00 : f32
    %385 = vector.broadcast %cst_87 : f32 to vector<3x64xf32>
    %386 = arith.maximumf %384, %385 : vector<3x64xf32>
    %cst_88 = arith.constant dense<0.000000e+00> : vector<3x2xf32>
    %387 = tpu.matmul %386, %10, %cst_88 {dimension_numbers = #tpu.dot_dimension_numbers<[1], [0], [0], [1], [0, 0, 1, 1], [], []>} : vector<3x64xf32>, vector<64x2xf32>, vector<3x2xf32> -> vector<3x2xf32>
    %388 = vector.broadcast %7 : vector<3x1xf32> to vector<3x2xf32>
    %389 = arith.mulf %387, %388 : vector<3x2xf32>
    %390 = vector.extract_strided_slice %389 {offsets = [0, 0], sizes = [1, 2], strides = [1, 1]} : vector<3x2xf32> to vector<1x2xf32>
    %391 = vector.extract_strided_slice %389 {offsets = [1, 0], sizes = [1, 2], strides = [1, 1]} : vector<3x2xf32> to vector<1x2xf32>
    %392 = arith.addf %390, %391 : vector<1x2xf32>
    %393 = vector.extract_strided_slice %389 {offsets = [2, 0], sizes = [1, 2], strides = [1, 1]} : vector<3x2xf32> to vector<1x2xf32>
    %394 = arith.addf %392, %393 : vector<1x2xf32>
    %395 = vector.broadcast %8 : vector<1x1xf32> to vector<1x2xf32>
    %396 = arith.addf %394, %395 : vector<1x2xf32>
    %c15 = arith.constant 15 : index
    %c0_89 = arith.constant 0 : index
    %397 = vector.load %arg1[%c15, %c0_89] : memref<16x64xf32, #tpu.memory_space<vmem>>, vector<1x64xf32>
    %398 = vector.broadcast %1 : vector<80x1xf32> to vector<80x64xf32>
    %399 = vector.broadcast %397 : vector<1x64xf32> to vector<80x64xf32>
    %400 = arith.mulf %398, %399 : vector<80x64xf32>
    %401 = arith.addf %11, %400 : vector<80x64xf32>
    %402 = vector.broadcast %2 : vector<80x1xf32> to vector<80x64xf32>
    %403 = arith.addf %401, %402 : vector<80x64xf32>
    %cst_90 = arith.constant 0.000000e+00 : f32
    %404 = vector.broadcast %cst_90 : f32 to vector<80x64xf32>
    %405 = arith.maximumf %403, %404 : vector<80x64xf32>
    %cst_91 = arith.constant dense<0.000000e+00> : vector<5x64xf32>
    %406 = tpu.matmul %3, %405, %cst_91 {dimension_numbers = #tpu.dot_dimension_numbers<[1], [0], [0], [1], [0, 0, 1, 1], [], []>} : vector<5x80xf32>, vector<80x64xf32>, vector<5x64xf32> -> vector<5x64xf32>
    %407 = vector.broadcast %4 : vector<5x1xf32> to vector<5x64xf32>
    %408 = arith.addf %406, %407 : vector<5x64xf32>
    %c0_92 = arith.constant 0 : index
    %c7 = arith.constant 7 : index
    %c0_93 = arith.constant 0 : index
    %c0_94 = arith.constant 0 : index
    %409 = vector.load %arg4[%c0_92, %c7, %c0_93, %c0_94] : memref<1x8x5x64xf32, #tpu.memory_space<vmem>>, vector<1x1x5x64xf32>
    %410 = vector.shape_cast %409 : vector<1x1x5x64xf32> to vector<5x64xf32>
    %411 = vector.shape_cast %408 : vector<5x64xf32> to vector<1x1x5x64xf32>
    tpu.vector_store %arg4[%c0_92, %c7, %c0_93, %c0_94], %411 {strides = array<i32>} : memref<1x8x5x64xf32, #tpu.memory_space<vmem>>, vector<1x1x5x64xf32>,
    %412 = vector.extract_strided_slice %408 {offsets = [0, 0], sizes = [1, 64], strides = [1, 1]} : vector<5x64xf32> to vector<1x64xf32>
    %413 = vector.extract_strided_slice %408 {offsets = [1, 0], sizes = [1, 64], strides = [1, 1]} : vector<5x64xf32> to vector<1x64xf32>
    %414 = arith.maximumf %412, %413 : vector<1x64xf32>
    %415 = vector.extract_strided_slice %408 {offsets = [2, 0], sizes = [1, 64], strides = [1, 1]} : vector<5x64xf32> to vector<1x64xf32>
    %416 = vector.extract_strided_slice %408 {offsets = [3, 0], sizes = [1, 64], strides = [1, 1]} : vector<5x64xf32> to vector<1x64xf32>
    %417 = arith.maximumf %415, %416 : vector<1x64xf32>
    %418 = vector.extract_strided_slice %408 {offsets = [4, 0], sizes = [1, 64], strides = [1, 1]} : vector<5x64xf32> to vector<1x64xf32>
    %419 = arith.maximumf %417, %418 : vector<1x64xf32>
    %420 = arith.maximumf %414, %419 : vector<1x64xf32>
    %421 = vector.broadcast %420 : vector<1x64xf32> to vector<5x64xf32>
    %422 = arith.subf %408, %421 : vector<5x64xf32>
    %423 = math.exp %422 : vector<5x64xf32>
    %424 = vector.extract_strided_slice %423 {offsets = [0, 0], sizes = [1, 64], strides = [1, 1]} : vector<5x64xf32> to vector<1x64xf32>
    %425 = vector.extract_strided_slice %423 {offsets = [1, 0], sizes = [1, 64], strides = [1, 1]} : vector<5x64xf32> to vector<1x64xf32>
    %426 = arith.addf %424, %425 : vector<1x64xf32>
    %427 = vector.extract_strided_slice %423 {offsets = [2, 0], sizes = [1, 64], strides = [1, 1]} : vector<5x64xf32> to vector<1x64xf32>
    %428 = arith.addf %426, %427 : vector<1x64xf32>
    %429 = vector.extract_strided_slice %423 {offsets = [3, 0], sizes = [1, 64], strides = [1, 1]} : vector<5x64xf32> to vector<1x64xf32>
    %430 = arith.addf %428, %429 : vector<1x64xf32>
    %431 = vector.extract_strided_slice %423 {offsets = [4, 0], sizes = [1, 64], strides = [1, 1]} : vector<5x64xf32> to vector<1x64xf32>
    %432 = arith.addf %430, %431 : vector<1x64xf32>
    %cst_95 = arith.constant dense<0.000000e+00> : vector<3x64xf32>
    %433 = tpu.matmul %5, %423, %cst_95 {dimension_numbers = #tpu.dot_dimension_numbers<[1], [0], [0], [1], [0, 0, 1, 1], [], []>} : vector<3x5xf32>, vector<5x64xf32>, vector<3x64xf32> -> vector<3x64xf32>
    %cst_96 = arith.constant 1.000000e+00 : f32
    %434 = vector.broadcast %cst_96 : f32 to vector<1x64xf32>
    %435 = arith.divf %434, %432 : vector<1x64xf32>
    %436 = vector.broadcast %435 : vector<1x64xf32> to vector<3x64xf32>
    %437 = arith.mulf %433, %436 : vector<3x64xf32>
    %438 = vector.broadcast %6 : vector<3x1xf32> to vector<3x64xf32>
    %439 = arith.addf %437, %438 : vector<3x64xf32>
    %cst_97 = arith.constant 0.000000e+00 : f32
    %440 = vector.broadcast %cst_97 : f32 to vector<3x64xf32>
    %441 = arith.maximumf %439, %440 : vector<3x64xf32>
    %cst_98 = arith.constant dense<0.000000e+00> : vector<3x2xf32>
    %442 = tpu.matmul %441, %10, %cst_98 {dimension_numbers = #tpu.dot_dimension_numbers<[1], [0], [0], [1], [0, 0, 1, 1], [], []>} : vector<3x64xf32>, vector<64x2xf32>, vector<3x2xf32> -> vector<3x2xf32>
    %443 = vector.broadcast %7 : vector<3x1xf32> to vector<3x2xf32>
    %444 = arith.mulf %442, %443 : vector<3x2xf32>
    %445 = vector.extract_strided_slice %444 {offsets = [0, 0], sizes = [1, 2], strides = [1, 1]} : vector<3x2xf32> to vector<1x2xf32>
    %446 = vector.extract_strided_slice %444 {offsets = [1, 0], sizes = [1, 2], strides = [1, 1]} : vector<3x2xf32> to vector<1x2xf32>
    %447 = arith.addf %445, %446 : vector<1x2xf32>
    %448 = vector.extract_strided_slice %444 {offsets = [2, 0], sizes = [1, 2], strides = [1, 1]} : vector<3x2xf32> to vector<1x2xf32>
    %449 = arith.addf %447, %448 : vector<1x2xf32>
    %450 = vector.broadcast %8 : vector<1x1xf32> to vector<1x2xf32>
    %451 = arith.addf %449, %450 : vector<1x2xf32>
    %452 = tpu.concatenate %66, %121, %176, %231, %286, %341, %396, %451 in 0 : vector<1x2xf32>, vector<1x2xf32>, vector<1x2xf32>, vector<1x2xf32>, vector<1x2xf32>, vector<1x2xf32>, vector<1x2xf32>, vector<1x2xf32> -> vector<8x2xf32>
    %c0_99 = arith.constant 0 : index
    %c0_100 = arith.constant 0 : index
    %c0_101 = arith.constant 0 : index
    %453 = vector.load %arg5[%c0_99, %c0_100, %c0_101] : memref<1x8x2xf32, #tpu.memory_space<vmem>>, vector<1x8x2xf32>
    %454 = vector.shape_cast %453 : vector<1x8x2xf32> to vector<8x2xf32>
    %455 = vector.shape_cast %452 : vector<8x2xf32> to vector<1x8x2xf32>
    tpu.vector_store %arg5[%c0_99, %c0_100, %c0_101], %455 {strides = array<i32>} : memref<1x8x2xf32, #tpu.memory_space<vmem>>, vector<1x8x2xf32>,
    return
  }
  func.func @transform_0(%arg0: i32) -> (i32, i32) {
    %c0_i32 = arith.constant 0 : i32
    %c0_i32_0 = arith.constant 0 : i32
    return %c0_i32, %arg0 : i32, i32
  }
  func.func @transform_1(%arg0: i32) -> (i32, i32) {
    %c0_i32 = arith.constant 0 : i32
    %c0_i32_0 = arith.constant 0 : i32
    %c0_i32_1 = arith.constant 0 : i32
    return %c0_i32, %c0_i32_0 : i32, i32
  }
  func.func @transform_2(%arg0: i32) -> (i32, i32) {
    %c0_i32 = arith.constant 0 : i32
    %c0_i32_0 = arith.constant 0 : i32
    %c0_i32_1 = arith.constant 0 : i32
    return %c0_i32, %c0_i32_0 : i32, i32
  }
  func.func @transform_3(%arg0: i32) -> (i32, i32, i32, i32) {
    %c0_i32 = arith.constant 0 : i32
    %c0_i32_0 = arith.constant 0 : i32
    %c0_i32_1 = arith.constant 0 : i32
    %c0_i32_2 = arith.constant 0 : i32
    return %arg0, %c0_i32, %c0_i32_0, %c0_i32_1 : i32, i32, i32, i32
  }
  func.func @transform_4(%arg0: i32) -> (i32, i32, i32) {
    %c0_i32 = arith.constant 0 : i32
    %c0_i32_0 = arith.constant 0 : i32
    %c0_i32_1 = arith.constant 0 : i32
    return %arg0, %c0_i32, %c0_i32_0 : i32, i32, i32
  }
}

</mosaic_0001>

<bundles_post_ra>
// kernel: analogy_pallas_forward.1
= control target key start
LH: loop header
LB: loop body
LE: loop exit
PB: predicated region body
PF: predicated region fallthrough
CT: control target
= control target key end

     0   :  { %v1705_v0 = vmov 9   ;;  %v1706_v1 = vmov 8   ;;  %vm38_vm0 = vcmask 64512   ;;  %vm243_vm1 = vcmask 654336   ;;  %s2685_s1 = inlined_call_operand.vmem [shape: f32[96,128], index: 1, kind: input, shape index: {}]   ;;  %s2686_s0 = inlined_call_operand.vmem [shape: f32[16,64], index: 0, kind: input, shape index: {}]   ;;  %s2687_s3 = inlined_call_operand.vmem [shape: f32[1,8,5,64], index: 3, kind: output, shape index: {0}]   ;;  %s2688_s2 = inlined_call_operand.vmem [shape: f32[64,2], index: 2, kind: input, shape index: {}]   ;;  %s2689_s4 = inlined_call_operand.vmem [shape: f32[1,8,2], index: 4, kind: output, shape index: {1}]  }
   0x1   :  { %1647 = vset.pattern.permute.xlu0 %v1705_v0  ;;  %1644 = vset.pattern.permute.xlu2 %v1706_v1  ;;  %v23_v2 = vld [vmem:[%s2685_s1 + $0x38] sm:$0xff]  ;;  %v22_v3 = vld [vmem:[%s2685_s1 + $0x30] sm:$0xff]  ;;  %v29_v4 = vld [vmem:[%s2686_s0] sm:$0xff]  ;;  %vm266_vm2 = vcmask 520192   ;;  %vm300_vm3 = vcmask 1044480   ;;  %vm296_vm4 = vcmask 39936  }
   0x2   :  { %1642 = vset.pattern.permute.xlu1 %v1706_v1  ;;  %203 = vperm.xlu0 %1647, %v22_v3   ;;  %v16_v5 = vld [vmem:[%s2685_s1] sm:$0xff]  ;;  %v25_v6 = vld [vmem:[%s2685_s1 + $0x48] sm:$0xff]  ;;  %v18_v10 = vld [vmem:[%s2685_s1 + $0x10] sm:$0xff]  ;;  %vm346_vm9 = vcmask 523264  }
   0x3   :  { %146 = vperm.xlu1 %1642, %v23_v2   ;;  %142 = vperm.xlu2 %1644, %v22_v3   ;;  %v24_v7 = vld [vmem:[%s2685_s1 + $0x40] sm:$0xff]  ;;  %v17_v8 = vld [vmem:[%s2685_s1 + $0x8] sm:$0xff]  ;;  %v19_v12 = vld [vmem:[%s2685_s1 + $0x18] sm:$0xff] }
   0x4   :  { %84 = vmatpush.msra.mxu0 %v29_v4  ;;  %v20_v9 = vld [vmem:[%s2685_s1 + $0x20] sm:$0xff]  ;;  %v21_v11 = vld [vmem:[%s2685_s1 + $0x28] sm:$0xff] }
   0x5   :  { %1587 = vmatmul.msk.f32.vlgmr.msra.gmra.mxu0 %vm38_vm0, %v16_v5  ;;  %v1808_v26 = vld [vmem:[%s2686_s0 + $0x9] ss:$0 sm:$0xff]  ;;  %v1815_v28 = vld [vmem:[%s2686_s0 + $0xa] ss:$0 sm:$0xff]  ;;  %v1820_v29 = vld [vmem:[%s2686_s0 + $0xb] ss:$0 sm:$0xff] }
   0x6   :  { %2692 = vst [vmem:[#allocation2_spill] sm:$0xff] %v1815_v28  ;;  %v1827_v31 = vld [vmem:[%s2686_s0 + $0xc] ss:$0 sm:$0xff]  ;;  %v1842_v37 = vld [vmem:[%s2686_s0 + $0x8] ss:$0 sm:$0xff] }
   0x7   :  { %2693 = vst [vmem:[#allocation3_spill] sm:$0xff] %v1820_v29  ;;  %v1847_v38 = vld [vmem:[%s2686_s0 + $0xd] ss:$0 sm:$0xff] }
   0xa   :  { %1648 = vset.pattern.permute.xlu0 %v1706_v1 }
   0xb   :  { %1643 = vset.pattern.permute.xlu1 %v1705_v0  ;;  %1645 = vset.pattern.permute.xlu2 %v1705_v0 }
   0xc   :  { %215 = vperm.xlu1 %1643, %v25_v6   ;;  %154 = vperm.xlu0 %1648, %v25_v6  }
   0xd   :  { %211 = vperm.xlu2 %1645, %v24_v7   ;;  %1588 = vmatmul.msk.f32.gmra.mxu0 %vm38_vm0, %v17_v8 }
  0x14   :  { %207 = vperm.xlu1 %1643, %v23_v2   ;;  %150 = vperm.xlu0 %1648, %v24_v7  }
  0x15   :  { %1646 = vset.pattern.permute.xlu2 %v1706_v1  ;;  %1589 = vmatmul.msk.f32.gmra.mxu0 %vm38_vm0, %v18_v10 }
  0x16   :  { %134 = vperm.xlu2 %1646, %v20_v9  }
  0x1c   :  { %1649 = vset.pattern.permute.xlu1 %v1706_v1  ;;  %138 = vperm.xlu0 %1648, %v21_v11  }
  0x1d   :  { %130 = vperm.xlu1 %1649, %v19_v12   ;;  %1590 = vmatmul.msk.f32.gmra.mxu0 %vm38_vm0, %v19_v12 }
  0x1e   :  { %1650 = vset.pattern.permute.xlu2 %v1705_v0 }
  0x1f   :  { %199 = vperm.xlu2 %1650, %v21_v11  }
  0x24   :  { %122 = vperm.xlu0 %1648, %v17_v8  }
  0x25   :  { %126 = vperm.xlu1 %1649, %v18_v10   ;;  %1591 = vmatmul.msk.f32.gmra.mxu0 %vm38_vm0, %v20_v9 }
  0x27   :  { %195 = vperm.xlu2 %1650, %v20_v9  }
  0x2c   :  { %1654 = vset.pattern.permute.xlu0 %v1705_v0 }
  0x2d   :  { %1651 = vset.pattern.permute.xlu1 %v1705_v0  ;;  %179 = vperm.xlu0 %1654, %v16_v5  }
  0x2e   :  { %191 = vperm.xlu1 %1651, %v19_v12   ;;  %1592 = vmatmul.msk.f32.gmra.mxu0 %vm38_vm0, %v21_v11 }
  0x2f   :  { %1652 = vset.pattern.permute.xlu2 %v1706_v1 }
  0x30   :  { %118 = vperm.xlu2 %1652, %v16_v5  }
  0x36   :  { %187 = vperm.xlu1 %1651, %v18_v10   ;;  %1593 = vmatmul.msk.f32.gmra.mxu0 %vm38_vm0, %v22_v3 }
  0x38   :  { %1653 = vset.pattern.permute.xlu2 %v1705_v0 }
  0x39   :  { %183 = vperm.xlu2 %1653, %v17_v8  }
  0x3e   :  { %1594 = vmatmul.msk.f32.gmra.mxu0 %vm38_vm0, %v23_v2 }
  0x46   :  { %1595 = vmatmul.msk.f32.gmra.mxu0 %vm38_vm0, %v24_v7 }
  0x4e   :  { %1596 = vmatmul.msk.f32.gmra.mxu0 %vm38_vm0, %v25_v6 }
  0x5d   :  { %v1779_v13 = vpop.permute.xlu2 %142 }
  0x67   :  { %v1781_v14 = vpop.permute.xlu2 %211 }
  0x70   :  { %v1787_v17 = vpop.permute.xlu2 %134 }
  0x71   :  { %v394_v3 = vmul.f32 %v1808_v26, %v1787_v17  ;;  %v559_v4 = vmul.f32 %v1815_v28, %v1787_v17  ;;  %v724_v6 = vmul.f32 %v1820_v29, %v1787_v17 }
  0x74   :  { %v1783_v15 = vpop.permute.xlu0 %203 }
  0x75   :  { %v1785_v16 = vpop.permute.xlu1 %146 }
  0x79   :  { %v1793_v20 = vpop.permute.xlu2 %199 }
  0x7e   :  { %v1789_v18 = vpop.permute.xlu0 %154  ;;  %v1791_v19 = vpop.permute.xlu1 %215 }
  0x81   :  { %v1801_v24 = vpop.permute.xlu2 %195 }
  0x82   :  { %v1795_v21 = vpop.f32.mrf.mxu0 }
  0x86   :  { %v1797_v22 = vpop.permute.xlu0 %150  ;;  %v1799_v23 = vpop.permute.xlu1 %207 }
  0x8a   :  { %v1803_v25 = vpop.f32.mrf.mxu0  ;;  %v1849_v39 = vpop.permute.xlu2 %118 }
  0x8b   :  { %v390_v48 = vmul.f32 %v1808_v26, %v1849_v39  ;;  %v555_v49 = vmul.f32 %v1815_v28, %v1849_v39 }
  0x8d   :  { %v400_v58 = vadd.f32 %v390_v48, %v1795_v21  ;;  %v565_v60 = vadd.f32 %v555_v49, %v1795_v21 }
  0x8e   :  { %v1810_v27 = vpop.permute.xlu0 %138 }
  0x8f   :  { %v1822_v30 = vpop.permute.xlu1 %130 }
  0x90   :  { %v393_v32 = vmul.f32 %v1808_v26, %v1822_v30  ;;  %v558_v33 = vmul.f32 %v1815_v28, %v1822_v30  ;;  %v723_v34 = vmul.f32 %v1820_v29, %v1822_v30  ;;  %v888_v35 = vmul.f32 %v1827_v31, %v1822_v30 }
  0x92   :  { %v1837_v36 = vpop.f32.mrf.mxu0 }
  0x96   :  { %v1851_v40 = vpop.permute.xlu0 %122 }
  0x97   :  { %v1853_v41 = vpop.permute.xlu1 %126  ;;  %v1857_v42 = vmul.f32 %v1808_v26, %v1851_v40  ;;  %v1861_v43 = vmul.f32 %v1815_v28, %v1851_v40  ;;  %v1891_v55 = vmul.f32 %v1820_v29, %v1851_v40 }
  0x98   :  { %v160_v44 = vmul.f32 %v1842_v37, %v1853_v41  ;;  %v1052_v45 = vmul.f32 %v1847_v38, %v1853_v41  ;;  %v392_v46 = vmul.f32 %v1808_v26, %v1853_v41  ;;  %v557_v47 = vmul.f32 %v1815_v28, %v1853_v41 }
  0x99   :  { %2694 = vst [vmem:[#allocation4_spill] sm:$0xff] %v1857_v42  ;;  %v722_v54 = vmul.f32 %v1820_v29, %v1853_v41 }
  0x9a   :  { %2695 = vst [vmem:[#allocation5_spill] sm:$0xff] %v1861_v43  ;;  %v1876_v50 = vadd.f32 %v160_v44, %v1837_v36  ;;  %v1879_v51 = vadd.f32 %v1052_v45, %v1837_v36  ;;  %v1882_v52 = vadd.f32 %v392_v46, %v1837_v36  ;;  %v1885_v53 = vadd.f32 %v557_v47, %v1837_v36  ;;  %v1893_v56 = vpop.f32.mrf.mxu0 }
  0x9b   :  { %2698 = vst [vmem:[#allocation8_spill] sm:$0xff] %v1891_v55  ;;  %v403_v57 = vadd.f32 %v393_v32, %v1893_v56  ;;  %v568_v59 = vadd.f32 %v558_v33, %v1893_v56  ;;  %v733_v62 = vadd.f32 %v723_v34, %v1893_v56  ;;  %v1903_v63 = vadd.f32 %v722_v54, %v1837_v36 }
  0x9c   :  { %2696 = vst [vmem:[#allocation6_spill] sm:$0xff] %v1882_v52  ;;  %v720_v32 = vmul.f32 %v1820_v29, %v1849_v39  ;;  %v889_v33 = vmul.f32 %v1827_v31, %v1787_v17  ;;  %v395_v34 = vmul.f32 %v1808_v26, %v1810_v27  ;;  %v560_v44 = vmul.f32 %v1815_v28, %v1810_v27 }
  0x9d   :  { %2697 = vst [vmem:[#allocation7_spill] sm:$0xff] %v1885_v53  ;;  %v725_v45 = vmul.f32 %v1820_v29, %v1810_v27  ;;  %v898_v54 = vadd.f32 %v888_v35, %v1893_v56  ;;  %v161_v53 = vmul.f32 %v1842_v37, %v1822_v30  ;;  %v2140_v43 = vmul.f32 %v1847_v38, %v1849_v39 }
  0x9e   :  { %2699 = vst [vmem:[#allocation9_spill] sm:$0xff] %v1903_v63  ;;  %v730_v46 = vadd.f32 %v720_v32, %v1795_v21 }
  0x9f   :  { %v1899_v61 = vpop.permute.xlu0 %179  ;;  %v171_v42 = vadd.f32 %v161_v53, %v1893_v56 }
  0xa0   :  { %v1905_v0 = vpop.permute.xlu1 %191  ;;  %v1908_v1 = vadd.f32 %v400_v58, %v1899_v61  ;;  %v1911_v2 = vadd.f32 %v565_v60, %v1899_v61  ;;  %v1953_v48 = vadd.f32 %v730_v46, %v1899_v61  ;;  %v885_v60 = vmul.f32 %v1827_v31, %v1849_v39 }
  0xa1   :  { %v1918_v5 = vadd.f32 %v403_v57, %v1905_v0  ;;  %v1925_v8 = vadd.f32 %v568_v59, %v1905_v0  ;;  %v1937_v12 = vadd.f32 %v733_v62, %v1905_v0  ;;  %v887_v57 = vmul.f32 %v1827_v31, %v1853_v41 }
  0xa2   :  { %2700 = vst [vmem:[#allocation10_spill] sm:$0xff] %v1908_v1  ;;  %v1922_v7 = vpop.f32.mrf.mxu0  ;;  %v895_v35 = vadd.f32 %v885_v60, %v1795_v21  ;;  %v1981_v32 = vadd.f32 %v898_v54, %v1905_v0  ;;  %v726_v60 = vmul.f32 %v1820_v29, %v1779_v13  ;;  %v891_v54 = vmul.f32 %v1827_v31, %v1779_v13 }
  0xa3   :  { %2701 = vst [vmem:[#allocation11_spill] sm:$0xff] %v1911_v2  ;;  %v1928_v9 = vadd.f32 %v394_v3, %v1922_v7  ;;  %v1931_v10 = vadd.f32 %v559_v4, %v1922_v7  ;;  %v1934_v11 = vadd.f32 %v724_v6, %v1922_v7  ;;  %v1956_v49 = vadd.f32 %v889_v33, %v1922_v7 }
  0xa4   :  { %2702 = vst [vmem:[#allocation12_spill] sm:$0xff] %v1918_v5  ;;  %v890_v3 = vmul.f32 %v1827_v31, %v1810_v27  ;;  %v396_v4 = vmul.f32 %v1808_v26, %v1779_v13  ;;  %v561_v33 = vmul.f32 %v1815_v28, %v1779_v13  ;;  %v1057_v2 = vmul.f32 %v1847_v38, %v1785_v16 }
  0xa5   :  { %2703 = vst [vmem:[#allocation13_spill] sm:$0xff] %v1925_v8  ;;  %v1707_v8 = vmov 80   ;;  %v1059_v1 = vmul.f32 %v1847_v38, %v1789_v18 }
  0xa6   :  { %2704 = vst [vmem:[#allocation14_spill] sm:$0xff] %v1928_v9  ;;  %1655 = vset.pattern.permute.xlu1 %v1707_v8  ;;  %v1058_v8 = vmul.f32 %v1847_v38, %v1797_v22  ;;  %v1051_v9 = vmul.f32 %v1847_v38, %v1851_v40 }
  0xa7   :  { %2705 = vst [vmem:[#allocation15_spill] sm:$0xff] %v1931_v10 }
  0xa8   :  { %2706 = vst [vmem:[#allocation16_spill] sm:$0xff] %v1934_v11 }
  0xa9   :  { %2707 = vst [vmem:[#allocation17_spill] sm:$0xff] %v1937_v12 }
  0xaa   :  { %2708 = vst [vmem:[#allocation18_spill] sm:$0xff] %v1953_v48 }
  0xab   :  { %v1950_v47 = vpop.f32.mrf.mxu0  ;;  %2709 = vst [vmem:[#allocation19_spill] sm:$0xff] %v1956_v49  ;;  %v727_v49 = vmul.f32 %v1820_v29, %v1785_v16 }
  0xac   :  { %v1962_v58 = vadd.f32 %v395_v34, %v1950_v47  ;;  %v1965_v59 = vadd.f32 %v560_v44, %v1950_v47  ;;  %v1970_v62 = vadd.f32 %v725_v45, %v1950_v47  ;;  %v1978_v6 = vadd.f32 %v890_v3, %v1950_v47  ;;  %2714 = vst [vmem:[#allocation24_spill] sm:$0xff] %v1981_v32 }
  0xad   :  { %v1986_v34 = vadd.f32 %v887_v57, %v1837_v36  ;;  %v1990_v44 = vmul.f32 %v1827_v31, %v1851_v40  ;;  %v1993_v45 = vadd.f32 %v895_v35, %v1899_v61 }
  0xae   :  { %2710 = vst [vmem:[#allocation20_spill] sm:$0xff] %v1962_v58 }
  0xaf   :  { %2711 = vst [vmem:[#allocation21_spill] sm:$0xff] %v1965_v59  ;;  %v1055_v59 = vmul.f32 %v1847_v38, %v1810_v27 }
  0xb0   :  { %2712 = vst [vmem:[#allocation22_spill] sm:$0xff] %v1970_v62 }
  0xb1   :  { %2713 = vst [vmem:[#allocation23_spill] sm:$0xff] %v1978_v6  ;;  %v892_v6 = vmul.f32 %v1827_v31, %v1785_v16 }
  0xb2   :  { %2715 = vst [vmem:[#allocation25_spill] sm:$0xff] %v1986_v34 }
  0xb3   :  { %2716 = vst [vmem:[#allocation26_spill] sm:$0xff] %v1990_v44  ;;  %v1995_v46 = vpop.f32.mrf.mxu0 }
  0xb4   :  { %2717 = vst [vmem:[#allocation27_spill] sm:$0xff] %v1993_v45  ;;  %v2002_v3 = vadd.f32 %v396_v4, %v1995_v46  ;;  %v2005_v57 = vadd.f32 %v561_v33, %v1995_v46  ;;  %v2008_v32 = vadd.f32 %v726_v60, %v1995_v46  ;;  %v2011_v35 = vadd.f32 %v891_v54, %v1995_v46  ;;  %v2016_v45 = vld [vmem:[%s2686_s0 + $0xf] ss:$0 sm:$0xff] }
  0xb5   :  { %v1386_v34 = vmul.f32 %v2016_v45, %v1779_v13  ;;  %v397_v4 = vmul.f32 %v1808_v26, %v1785_v16  ;;  %v562_v33 = vmul.f32 %v1815_v28, %v1785_v16  ;;  %v1383_v54 = vmul.f32 %v2016_v45, %v1822_v30 }
  0xb6   :  { %2718 = vst [vmem:[#allocation28_spill] sm:$0xff] %v2002_v3  ;;  %v1382_v48 = vmul.f32 %v2016_v45, %v1853_v41  ;;  %v1385_v11 = vmul.f32 %v2016_v45, %v1810_v27  ;;  %v1384_v62 = vmul.f32 %v2016_v45, %v1787_v17 }
  0xb7   :  { %2719 = vst [vmem:[#allocation29_spill] sm:$0xff] %v2005_v57  ;;  %v2025_v60 = vadd.f32 %v1386_v34, %v1995_v46  ;;  %v1053_v57 = vmul.f32 %v1847_v38, %v1822_v30 }
  0xb8   :  { %2720 = vst [vmem:[#allocation30_spill] sm:$0xff] %v2008_v32 }
  0xb9   :  { %2721 = vst [vmem:[#allocation31_spill] sm:$0xff] %v2011_v35  ;;  %v1387_v35 = vmul.f32 %v2016_v45, %v1785_v16 }
  0xba   :  { %2722 = vst [vmem:[#allocation32_spill] sm:$0xff] %v2025_v60 }
  0xbb   :  { %v2029_v44 = vpop.f32.mrf.mxu0 }
  0xbc   :  { %v2040_v34 = vadd.f32 %v397_v4, %v2029_v44  ;;  %v2043_v60 = vadd.f32 %v562_v33, %v2029_v44  ;;  %v2046_v12 = vadd.f32 %v727_v49, %v2029_v44  ;;  %v2049_v63 = vadd.f32 %v892_v6, %v2029_v44  ;;  %v2061_v4 = vld [vmem:[%s2686_s0 + $0xe] ss:$0 sm:$0xff] }
  0xbd   :  { %v2052_v55 = vadd.f32 %v1387_v35, %v2029_v44  ;;  %v398_v49 = vmul.f32 %v1808_v26, %v1797_v22  ;;  %v2066_v6 = vadd.f32 %v1385_v11, %v1950_v47  ;;  %v2069_v35 = vadd.f32 %v1384_v62, %v1922_v7 }
  0xbe   :  { %2723 = vst [vmem:[#allocation33_spill] sm:$0xff] %v2040_v34  ;;  %v1393_v33 = vadd.f32 %v1383_v54, %v1893_v56  ;;  %v728_v11 = vmul.f32 %v1820_v29, %v1797_v22  ;;  %v893_v62 = vmul.f32 %v1827_v31, %v1797_v22  ;;  %v2089_v54 = vmul.f32 %v2061_v4, %v1822_v30 }
  0xbf   :  { %2724 = vst [vmem:[#allocation34_spill] sm:$0xff] %v2043_v60  ;;  %v165_v29 = vmul.f32 %v1842_v37, %v1785_v16  ;;  %v159_v60 = vmul.f32 %v1842_v37, %v1851_v40  ;;  %v1067_v30 = vadd.f32 %v1057_v2, %v2029_v44 }
  0xc0   :  { %2725 = vst [vmem:[#allocation35_spill] sm:$0xff] %v2046_v12  ;;  %v563_v12 = vmul.f32 %v1815_v28, %v1797_v22  ;;  %v2155_v28 = vadd.f32 %v1393_v33, %v1905_v0  ;;  %v1380_v33 = vmul.f32 %v2016_v45, %v1849_v39 }
  0xc1   :  { %2726 = vst [vmem:[#allocation36_spill] sm:$0xff] %v2049_v63  ;;  %v2077_v63 = vmul.f32 %v2016_v45, %v1851_v40  ;;  %v175_v52 = vadd.f32 %v165_v29, %v2029_v44 }
  0xc2   :  { %2727 = vst [vmem:[#allocation37_spill] sm:$0xff] %v2052_v55  ;;  %v2073_v55 = vadd.f32 %v1382_v48, %v1837_v36  ;;  %v162_v48 = vmul.f32 %v1842_v37, %v1787_v17 }
  0xc3   :  { %2728 = vst [vmem:[#allocation38_spill] sm:$0xff] %v2066_v6  ;;  %v2079_v32 = vpop.f32.mrf.mxu0 }
  0xc4   :  { %2729 = vst [vmem:[#allocation39_spill] sm:$0xff] %v2069_v35  ;;  %v2099_v35 = vadd.f32 %v563_v12, %v2079_v32  ;;  %v2102_v6 = vadd.f32 %v728_v11, %v2079_v32  ;;  %v2105_v31 = vadd.f32 %v893_v62, %v2079_v32  ;;  %v2116_v12 = vld [vmem:[%s2685_s1 + $0x50] sm:$0x1f]  ;;  %v166_v62 = vmul.f32 %v1842_v37, %v1797_v22 }
  0xc5   :  { %2730 = vst [vmem:[#allocation40_spill] sm:$0xff] %v2073_v55  ;;  %v2094_v55 = vadd.f32 %v398_v49, %v2079_v32  ;;  %v1054_v49 = vmul.f32 %v1847_v38, %v1787_v17  ;;  %240 = vperm.xlu1 %1655, %v2116_v12   ;;  %v1068_v5 = vadd.f32 %v1058_v8, %v2079_v32 }
  0xc6   :  { %2731 = vst [vmem:[#allocation41_spill] sm:$0xff] %v2077_v63  ;;  %v1388_v63 = vmul.f32 %v2016_v45, %v1797_v22  ;;  %v176_v10 = vadd.f32 %v166_v62, %v2079_v32  ;;  %v172_v8 = vadd.f32 %v162_v48, %v1922_v7  ;;  %v225_v48 = vadd.f32 %v1799_v23, %v175_v52 }
  0xc7   :  { %2732 = vst [vmem:[#allocation42_spill] sm:$0xff] %v2099_v35  ;;  %v167_v35 = vmul.f32 %v1842_v37, %v1789_v18  ;;  %v1077_v45 = vadd.f32 %v1067_v30, %v1799_v23 }
  0xc8   :  { %2733 = vst [vmem:[#allocation43_spill] sm:$0xff] %v2102_v6  ;;  %v2119_v11 = vadd.f32 %v1388_v63, %v2079_v32  ;;  %v1056_v6 = vmul.f32 %v1847_v38, %v1779_v13  ;;  %v163_v63 = vmul.f32 %v1842_v37, %v1810_v27 }
  0xc9   :  { %2734 = vst [vmem:[#allocation44_spill] sm:$0xff] %v2105_v31  ;;  %v164_v31 = vmul.f32 %v1842_v37, %v1779_v13 }
  0xca   :  { %2735 = vst [vmem:[#allocation45_spill] sm:$0xff] %v2119_v11  ;;  %v2136_v11 = vmul.f32 %v1842_v37, %v1849_v39  ;;  %v1066_v2 = vadd.f32 %v1056_v6, %v1995_v46  ;;  %v173_v53 = vadd.f32 %v163_v63, %v1950_v47  ;;  %v1390_v63 = vadd.f32 %v1380_v33, %v1795_v21 }
  0xcb   :  { %2736 = vst [vmem:[#allocation46_spill] sm:$0xff] %v2155_v28  ;;  %v2157_v62 = vpop.f32.mrf.mxu0  ;;  %v226_v28 = vadd.f32 %v1781_v14, %v176_v10  ;;  %v174_v29 = vadd.f32 %v164_v31, %v1995_v46  ;;  %v1065_v10 = vadd.f32 %v1055_v59, %v1950_v47  ;;  %v1219_v31 = vmul.f32 %v2061_v4, %v1787_v17 }
  0xcc   :  { %v177_v37 = vadd.f32 %v167_v35, %v2157_v62  ;;  %v1069_v58 = vadd.f32 %v1059_v1, %v2157_v62  ;;  %v1078_v35 = vadd.f32 %v1068_v5, %v1781_v14  ;;  %v1064_v1 = vadd.f32 %v1054_v49, %v1922_v7 }
  0xcd   :  { %v224_v5 = vadd.f32 %v1783_v15, %v174_v29  ;;  %v1076_v49 = vadd.f32 %v1066_v2, %v1783_v15  ;;  %v223_v52 = vadd.f32 %v1793_v20, %v173_v53  ;;  %v2189_v30 = vadd.f32 %v1390_v63, %v1899_v61 }
  0xce   :  { %v227_v3 = vadd.f32 %v1791_v19, %v177_v37  ;;  %v1079_v38 = vadd.f32 %v1069_v58, %v1791_v19  ;;  %v1221_v58 = vmul.f32 %v2061_v4, %v1779_v13  ;;  %v236_v37 = vmax.f32 %v226_v28, 0.0 }
  0xcf   :  { %v1088_v59 = vmax.f32 %v1078_v35, 0.0  ;;  %v1075_v13 = vadd.f32 %v1065_v10, %v1793_v20  ;;  %v2198_v28 = vadd.f32 %v1219_v31, %v1922_v7  ;;  %v1228_v33 = vadd.f32 %v2089_v54, %v1893_v56 }
  0xd0   :  { %v237_v6 = vmax.f32 %v227_v3, 0.0  ;;  %v1089_v34 = vmax.f32 %v1079_v38, 0.0  ;;  %v2192_v17 = vadd.f32 %v1221_v58, %v1995_v46  ;;  %v1220_v3 = vmul.f32 %v2061_v4, %v1810_v27 }
  0xd1   :  { %v235_v29 = vmax.f32 %v225_v48, 0.0  ;;  %v1087_v2 = vmax.f32 %v1077_v45, 0.0  ;;  %v2209_v27 = vmul.f32 %v2061_v4, %v1851_v40  ;;  %v1063_v7 = vadd.f32 %v1053_v57, %v1893_v56  ;;  %v2222_v48 = vpop.permute.xlu1 %187 }
  0xd2   :  { %252 = vmatpush.msra.mxu1 %v237_v6  ;;  %1096 = vmatpush.msrb.mxu0 %v1089_v34  ;;  %v1217_v34 = vmul.f32 %v2061_v4, %v1853_v41  ;;  %v2205_v46 = vadd.f32 %v1220_v3, %v1950_v47  ;;  %v2213_v53 = vadd.f32 %v1228_v33, %v1905_v0  ;;  %v234_v38 = vmax.f32 %v224_v5, 0.0 }
  0xd3   :  { %v1215_v41 = vmul.f32 %v2061_v4, %v1849_v39  ;;  %v1086_v47 = vmax.f32 %v1076_v49, 0.0  ;;  %v222_v35 = vadd.f32 %v1801_v24, %v172_v8  ;;  %v1074_v40 = vadd.f32 %v1064_v1, %v1801_v24  ;;  %v2231_v1 = vpop.permute.xlu2 %183 }
  0xd4   :  { %253 = vmatpush.msra.mxu1 %v236_v37  ;;  %1097 = vmatpush.msrb.mxu0 %v1088_v59  ;;  %v2216_v54 = vadd.f32 %v1217_v34, %v1837_v36  ;;  %v169_v56 = vadd.f32 %v159_v60, %v1803_v25  ;;  %v1061_v57 = vadd.f32 %v1051_v9, %v1803_v25  ;;  %v233_v39 = vmax.f32 %v223_v52, 0.0 }
  0xd5   :  { %v1222_v36 = vmul.f32 %v2061_v4, %v1785_v16  ;;  %v1225_v45 = vadd.f32 %v1215_v41, %v1795_v21  ;;  %v1085_v10 = vmax.f32 %v1075_v13, 0.0  ;;  %v221_v31 = vadd.f32 %v1905_v0, %v171_v42 }
  0xd6   :  { %254 = vmatpush.msra.mxu1 %v235_v29  ;;  %1098 = vmatpush.msrb.mxu0 %v1087_v2  ;;  %v1073_v8 = vadd.f32 %v1063_v7, %v1905_v0  ;;  %v232_v16 = vmax.f32 %v222_v35, 0.0  ;;  %v1084_v60 = vmax.f32 %v1074_v40, 0.0  ;;  %v220_v63 = vadd.f32 %v2222_v48, %v1876_v50 }
  0xd7   :  { %v2234_v6 = vadd.f32 %v1222_v36, %v2029_v44  ;;  %v2237_v9 = vadd.f32 %v1225_v45, %v1899_v61  ;;  %v1072_v42 = vadd.f32 %v1879_v51, %v2222_v48  ;;  %v168_v0 = vadd.f32 %v2136_v11, %v1795_v21 }
  0xd8   :  { %255 = vmatpush.msra.mxu1 %v234_v38  ;;  %1099 = vmatpush.msrb.mxu0 %v1086_v47  ;;  %v1060_v44 = vadd.f32 %v2140_v43, %v1795_v21  ;;  %v231_v58 = vmax.f32 %v221_v31, 0.0  ;;  %v1083_v37 = vmax.f32 %v1073_v8, 0.0  ;;  %v219_v5 = vadd.f32 %v2231_v1, %v169_v56  ;;  %v2737_v8 = vld [vmem:[#allocation33_spill] sm:$0xff] }
  0xd9   :  { %v1071_v49 = vadd.f32 %v1061_v57, %v2231_v1  ;;  %v230_v50 = vmax.f32 %v220_v63, 0.0  ;;  %v1082_v52 = vmax.f32 %v1072_v42, 0.0  ;;  %v218_v51 = vadd.f32 %v1899_v61, %v168_v0  ;;  %v2738_v63 = vld [vmem:[#allocation28_spill] sm:$0xff] }
  0xda   :  { %256 = vmatpush.msra.mxu1 %v233_v39  ;;  %1100 = vmatpush.msrb.mxu0 %v1085_v10  ;;  %v1070_v59 = vadd.f32 %v1060_v44, %v1899_v61  ;;  %v1223_v11 = vmul.f32 %v2061_v4, %v1797_v22  ;;  %v229_v21 = vmax.f32 %v219_v5, 0.0  ;;  %v399_v56 = vmul.f32 %v1808_v26, %v1789_v18  ;;  %v2282_v39 = vld [vmem:[%s2685_s1 + $0x58] sm:$0x7] }
  0xdb   :  { %v1081_v43 = vmax.f32 %v1071_v49, 0.0  ;;  %v228_v13 = vmax.f32 %v218_v51, 0.0  ;;  %v418_v10 = vadd.f32 %v2094_v55, %v1781_v14  ;;  %v416_v42 = vadd.f32 %v2738_v63, %v1783_v15  ;;  %v2739_v55 = vld [vmem:[#allocation20_spill] sm:$0xff]  ;;  %v2305_v51 = vld [vmem:[%s2688_s2 + $0x38] sm:$0xff] }
  0xdc   :  { %257 = vmatpush.msra.mxu1 %v232_v16  ;;  %1101 = vmatpush.msrb.mxu0 %v1084_v60  ;;  %v2254_v3 = vadd.f32 %v1223_v11, %v2079_v32  ;;  %v1080_v33 = vmax.f32 %v1070_v59, 0.0  ;;  %v409_v36 = vadd.f32 %v399_v56, %v2157_v62  ;;  %v417_v16 = vadd.f32 %v2737_v8, %v1799_v23  ;;  %v2742_v11 = vld [vmem:[#allocation6_spill] sm:$0xff] }
  0xdd   :  { %v428_v60 = vmax.f32 %v418_v10, 0.0  ;;  %v415_v44 = vadd.f32 %v2739_v55, %v1793_v20  ;;  %358 = vmatpush.msra.mxu3 %v2305_v51  ;;  %v2747_v10 = vld [vmem:[#allocation34_spill] sm:$0xff] }
  0xde   :  { %258 = vmatpush.msra.mxu1 %v231_v58  ;;  %1102 = vmatpush.msrb.mxu0 %v1083_v37  ;;  %v419_v45 = vadd.f32 %v409_v36, %v1791_v19  ;;  %v427_v0 = vmax.f32 %v417_v16, 0.0  ;;  %v426_v58 = vmax.f32 %v416_v42, 0.0  ;;  %v2740_v37 = vld [vmem:[#allocation14_spill] sm:$0xff]  ;;  %v2748_v16 = vld [vmem:[#allocation29_spill] sm:$0xff] }
  0xdf   :  { %v414_v5 = vadd.f32 %v2740_v37, %v1801_v24  ;;  %v425_v49 = vmax.f32 %v415_v44, 0.0  ;;  %v2749_v42 = vld [vmem:[#allocation21_spill] sm:$0xff]  ;;  %v2750_v44 = vld [vmem:[#allocation15_spill] sm:$0xff] }
  0xe0   :  { %259 = vmatpush.msra.mxu1 %v230_v50  ;;  %1103 = vmatpush.msrb.mxu0 %v1082_v52  ;;  %v429_v26 = vmax.f32 %v419_v45, 0.0  ;;  %v2741_v50 = vld [vmem:[#allocation4_spill] sm:$0xff] }
  0xe1   :  { %v401_v52 = vadd.f32 %v2741_v50, %v1803_v25  ;;  %v424_v59 = vmax.f32 %v414_v5, 0.0  ;;  %v2751_v5 = vld [vmem:[#allocation5_spill] sm:$0xff] }
  0xe2   :  { %260 = vmatpush.msra.mxu1 %v229_v21  ;;  %1104 = vmatpush.msrb.mxu0 %v1081_v43  ;;  %v412_v21 = vadd.f32 %v2742_v11, %v2222_v48  ;;  %v2743_v43 = vld [vmem:[#allocation2_spill] sm:$0xff]  ;;  %v2753_v11 = vld [vmem:[#allocation13_spill] sm:$0xff] }
  0xe4   :  { %261 = vmatpush.msra.mxu1 %v228_v13  ;;  %1105 = vmatpush.msrb.mxu0 %v1080_v33  ;;  %v564_v13 = vmul.f32 %v2743_v43, %v1789_v18  ;;  %v1708_v33 = vmov 5  }
  0xe5   :  { %1597 = vmatmul.msk.f32.vlgmr.msra.gmra.mxu1 %vm243_vm1, %v2116_v12  ;;  %1621 = vmatmul.msk.f32.vlgmr.msrb.gmra.mxu0 %vm243_vm1, %v2116_v12 }
  0xe6   :  { %1656 = vset.pattern.permute.xlu2 %v1708_v33  ;;  %1357 = vmatpush.msra.mxu0 %v2305_v51 }
  0xe7   :  { %341 = vperm.xlu2 %1656, %v2282_v39  }
 0x137   :  { %v2260_v22 = vpop.permute.xlu1 %240 }
 0x162   :  { %v263_v61 = vpop.f32.mrf.mxu1  ;;  %v1107_v4 = vpop.f32.mrf.mxu0 }
 0x163   :  { %v264_v32 = vadd.f32 %v263_v61, %v2260_v22  ;;  %v2264_v34 = vadd.f32 %v1107_v4, %v2260_v22  ;;  %v2314_v61 = vld [vmem:[%s2688_s2 + $0x30] sm:$0xff] }
 0x164   :  { %v2744_v4 = vld [vmem:[#allocation12_spill] sm:$0xff]  ;;  %359 = vmatpush.msra.mxu3 %v2314_v61  ;;  %1358 = vmatpush.msra.mxu0 %v2314_v61 }
 0x165   :  { %267 = vst.msk [vmem:[%s2687_s3] sm:$0x1f] %vm266_vm2, %v264_v32  ;;  %v269_v29 = vrot.slane %v264_v32, 1  ;;  %v272_v7 = vrot.slane %v264_v32, 2 }
 0x166   :  { %1622 = vst.msk [vmem:[%s2687_s3 + $0x28] sm:$0x1f] %vm266_vm2, %v2264_v34 }
 0x167   :  { %v271_v2 = vmax.f32 %v264_v32, %v269_v29  ;;  %v411_v29 = vadd.f32 %v401_v52, %v2231_v1  ;;  %v2752_v52 = vld [vmem:[#allocation7_spill] sm:$0xff] }
 0x169   :  { %v274_v41 = vmax.f32 %v271_v2, %v272_v7  ;;  %v2324_v7 = vld [vmem:[%s2688_s2 + $0x28] sm:$0xff] }
 0x16a   :  { %360 = vmatpush.msra.mxu3 %v2324_v7  ;;  %1359 = vmatpush.msra.mxu0 %v2324_v7 }
 0x16b   :  { %v276_v38 = vrot.slane %v274_v41, 2  ;;  %v422_v41 = vmax.f32 %v412_v21, 0.0  ;;  %v588_v21 = vmax.f32 %v2753_v11, 0.0 }
 0x16d   :  { %v278_v47 = vmax.f32 %v271_v2, %v276_v38  ;;  %v574_v2 = vadd.f32 %v564_v13, %v2157_v62  ;;  %v2331_v38 = vld [vmem:[%s2688_s2 + $0x20] sm:$0xff] }
 0x16e   :  { %361 = vmatpush.msra.mxu3 %v2331_v38  ;;  %1360 = vmatpush.msra.mxu0 %v2331_v38 }
 0x16f   :  { %v279_v35 = vperm.slane %v278_v47, 0  ;;  %v421_v47 = vmax.f32 %v411_v29, 0.0 }
 0x171   :  { %v280_v40 = vsub.f32 %v264_v32, %v279_v35  ;;  %v423_v32 = vmax.f32 %v2744_v4, 0.0  ;;  %v584_v35 = vadd.f32 %v574_v2, %v1791_v19  ;;  %v2754_v4 = vld [vmem:[#allocation11_spill] sm:$0xff] }
 0x173   :  { %v281_v57 = vmul.f32 1.442695, %v280_v40  ;;  %v2745_v40 = vld [vmem:[#allocation10_spill] sm:$0xff]  ;;  %v594_v45 = vmax.f32 %v584_v35, 0.0 }
 0x174   :  { %v420_v56 = vmax.f32 %v2745_v40, 0.0 }
 0x175   :  { %1668 = vpow2.f32 %v281_v57  ;;  %v2746_v57 = vld [vmem:[#allocation42_spill] sm:$0xff] }
 0x176   :  { %v583_v36 = vadd.f32 %v2746_v57, %v1781_v14 }
 0x178   :  { %v593_v8 = vmax.f32 %v583_v36, 0.0  ;;  %v2369_v36 = vld [vmem:[%s2688_s2 + $0x18] sm:$0xff] }
 0x179   :  { %362 = vmatpush.msra.mxu3 %v2369_v36  ;;  %1361 = vmatpush.msra.mxu0 %v2369_v36 }
 0x17b   :  { %v2286_v31 = vpop.eup %1668 }
 0x17c   :  { %1598 = vmatpush.msk.msra.mxu2 %vm300_vm3, %v2286_v31  ;;  %v284_v29 = vrot.slane %v2286_v31, 1  ;;  %v290_v35 = vrot.slane %v2286_v31, 3 }
 0x17d   :  { %1599 = vmatmul.msk.f32.vlgmr.msra.gmra.mxu2 %vm296_vm4, %v2282_v39 }
 0x17e   :  { %436 = vmatpush.msrb.mxu2 %v429_v26  ;;  %v582_v26 = vadd.f32 %v2747_v10, %v1799_v23  ;;  %v286_v2 = vadd.f32 %v2286_v31, %v284_v29  ;;  %v2388_v10 = vld [vmem:[%s2688_s2] sm:$0xff]  ;;  %v28_v29 = vld [vmem:[%s2685_s1 + $0x5b] sm:$0x1] }
 0x180   :  { %437 = vmatpush.msrb.mxu2 %v428_v60  ;;  %v581_v60 = vadd.f32 %v2748_v16, %v1783_v15  ;;  %v592_v63 = vmax.f32 %v582_v26, 0.0 }
 0x182   :  { %438 = vmatpush.msrb.mxu2 %v427_v0  ;;  %v580_v0 = vadd.f32 %v2749_v42, %v1793_v20  ;;  %v591_v55 = vmax.f32 %v581_v60, 0.0 }
 0x184   :  { %439 = vmatpush.msrb.mxu2 %v426_v58  ;;  %v579_v58 = vadd.f32 %v2750_v44, %v1801_v24  ;;  %v590_v37 = vmax.f32 %v580_v0, 0.0  ;;  %v1709_v44 = vmov 6  }
 0x185   :  { %1657 = vset.pattern.permute.xlu1 %v1709_v44  ;;  %v2755_v44 = vld [vmem:[#allocation3_spill] sm:$0xff] }
 0x186   :  { %440 = vmatpush.msrb.mxu2 %v425_v49  ;;  %v566_v49 = vadd.f32 %v2751_v5, %v1803_v25  ;;  %v589_v50 = vmax.f32 %v579_v58, 0.0  ;;  %371 = vperm.xlu1 %1657, %v2282_v39  }
 0x188   :  { %441 = vmatpush.msrb.mxu2 %v424_v59  ;;  %v577_v59 = vadd.f32 %v2752_v52, %v2222_v48  ;;  %v576_v43 = vadd.f32 %v566_v49, %v2231_v1 }
 0x18a   :  { %442 = vmatpush.msrb.mxu2 %v423_v32  ;;  %v587_v13 = vmax.f32 %v577_v59, 0.0  ;;  %v586_v33 = vmax.f32 %v576_v43, 0.0  ;;  %v585_v32 = vmax.f32 %v2754_v4, 0.0 }
 0x18c   :  { %443 = vmatpush.msrb.mxu2 %v422_v41  ;;  %v287_v41 = vrot.slane %v2286_v31, 2 }
 0x18e   :  { %444 = vmatpush.msrb.mxu2 %v421_v47  ;;  %v289_v47 = vadd.f32 %v287_v41, %v286_v2 }
 0x190   :  { %445 = vmatpush.msrb.mxu2 %v420_v56  ;;  %v292_v40 = vadd.f32 %v290_v35, %v289_v47  ;;  %v293_v56 = vrot.slane %v2286_v31, 4  ;;  %v2381_v31 = vld [vmem:[%s2688_s2 + $0x8] sm:$0xff] }
 0x191   :  { %1601 = vmatmul.msk.f32.vlgmr.msrb.gmra.mxu2 %vm243_vm1, %v2116_v12 }
 0x192   :  { %601 = vmatpush.msra.mxu2 %v594_v45  ;;  %v295_v57 = vadd.f32 %v293_v56, %v292_v40  ;;  %v2374_v45 = vld [vmem:[%s2688_s2 + $0x10] sm:$0xff] }
 0x193   :  { %363 = vmatpush.msra.mxu3 %v2374_v45  ;;  %1362 = vmatpush.msra.mxu0 %v2374_v45 }
 0x194   :  { %602 = vmatpush.msra.mxu2 %v593_v8  ;;  %1670 = vrcp.f32 %v295_v57  ;;  %v334_v42 = vand.u32 2147483648, %v295_v57  ;;  %vm328_vm6 = vweird.f32 %v295_v57  ;;  %v332_v0 = vand.u32 2147483647, %v295_v57 }
 0x195   :  { %364 = vmatpush.msra.mxu3 %v2381_v31  ;;  %1363 = vmatpush.msra.mxu0 %v2381_v31 }
 0x196   :  { %603 = vmatpush.msra.mxu2 %v592_v63  ;;  %v335_v58 = vor.u32 1.1754944e-38, %v334_v42  ;;  %vm333_vm8 = vcmp.eq.f32.partialorder %v332_v0, 8.507059e+37 }
 0x197   :  { %365 = vmatpush.msra.mxu3 %v2388_v10  ;;  %1364 = vmatpush.msra.mxu0 %v2388_v10 }
 0x198   :  { %604 = vmatpush.msra.mxu2 %v591_v55 }
 0x19a   :  { %605 = vmatpush.msra.mxu2 %v590_v37  ;;  %v1671_v26 = vpop.eup %1670 }
 0x19b   :  { %v324_v8 = vmul.f32 %v1671_v26, %v295_v57  ;;  %vm329_vm5 = vweird.f32 %v1671_v26 }
 0x19c   :  { %606 = vmatpush.msra.mxu2 %v589_v50  ;;  %vm330_vm7 = vmor %vm328_vm6, %vm329_vm5  ;;  %v2395_v50 = vpop.permute.xlu2 %341  ;;  %vm1564_vm6 = vcmask 1040384  }
 0x19d   :  { %v325_v16 = vsub.f32 1.0, %v324_v8 }
 0x19e   :  { %607 = vmatpush.msra.mxu2 %v588_v21 }
 0x19f   :  { %v326_v60 = vmul.f32 %v1671_v26, %v325_v16 }
 0x1a0   :  { %608 = vmatpush.msra.mxu2 %v587_v13 }
 0x1a1   :  { %v327_v63 = vadd.f32 %v1671_v26, %v326_v60 }
 0x1a2   :  { %609 = vmatpush.msra.mxu2 %v586_v33 }
 0x1a3   :  { %v331_v55 = vsel %vm330_vm7, %v1671_v26, %v327_v63 }
 0x1a4   :  { %610 = vmatpush.msra.mxu2 %v585_v32  ;;  %v336_v37 = vsel %vm333_vm8, %v335_v58, %v331_v55  ;;  %v1710_v32 = vmov 0   ;;  %v729_v58 = vmul.f32 %v2755_v44, %v1789_v18 }
 0x1a5   :  { %1606 = vmatmul.msk.f32.vlgmr.msra.gmra.mxu2 %vm243_vm1, %v2116_v12  ;;  %v338_v5 = vperm.slane %v336_v37, 0  ;;  %1658 = vset.pattern.permute.xlu2 %v1710_v32 }
 0x1a6   :  { %1659 = vset.pattern.permute.xlu0 %v1710_v32  ;;  %384 = vperm.xlu2 %1658, %v28_v29   ;;  %v2758_v32 = vld [vmem:[#allocation30_spill] sm:$0xff] }
 0x1a7   :  { %v746_v29 = vadd.f32 %v2758_v32, %v1783_v15 }
 0x200   :  { %v320_v49 = vpop.f32.mrf.mxu2 }
 0x201   :  { %v339_v52 = vmul.f32 %v338_v5, %v320_v49  ;;  %v739_v5 = vadd.f32 %v729_v58, %v2157_v62 }
 0x203   :  { %v344_v59 = vadd.f32 %v2395_v50, %v339_v52 }
 0x205   :  { %v345_v11 = vmax.f32 %v344_v59, 0.0  ;;  %v749_v59 = vadd.f32 %v739_v5, %v1791_v19 }
 0x207   :  { %1600 = vmatmul.msk.f32.vlgmr.msra.gmra.mxu3 %vm346_vm9, %v345_v11  ;;  %v2756_v11 = vld [vmem:[#allocation43_spill] sm:$0xff] }
 0x214   :  { %v447_v21 = vpop.f32.mrf.mxu2 }
 0x215   :  { %v448_v43 = vadd.f32 %v447_v21, %v2260_v22  ;;  %v748_v21 = vadd.f32 %v2756_v11, %v1781_v14 }
 0x217   :  { %1602 = vst.msk [vmem:[%s2687_s3 + $0x8] sm:$0x1f] %vm266_vm2, %v448_v43  ;;  %v453_v13 = vrot.slane %v448_v43, 1  ;;  %v456_v4 = vrot.slane %v448_v43, 2 }
 0x219   :  { %v455_v33 = vmax.f32 %v448_v43, %v453_v13  ;;  %v2757_v13 = vld [vmem:[#allocation35_spill] sm:$0xff] }
 0x21b   :  { %v458_v2 = vmax.f32 %v455_v33, %v456_v4  ;;  %v758_v4 = vmax.f32 %v748_v21, 0.0 }
 0x21d   :  { %v460_v41 = vrot.slane %v458_v2, 2 }
 0x21f   :  { %v462_v47 = vmax.f32 %v455_v33, %v460_v41  ;;  %v747_v33 = vadd.f32 %v2757_v13, %v1799_v23 }
 0x221   :  { %v463_v35 = vperm.slane %v462_v47, 0  ;;  %v757_v41 = vmax.f32 %v747_v33, 0.0  ;;  %v2759_v47 = vld [vmem:[#allocation22_spill] sm:$0xff] }
 0x223   :  { %v464_v40 = vsub.f32 %v448_v43, %v463_v35  ;;  %v759_v43 = vmax.f32 %v749_v59, 0.0  ;;  %v745_v35 = vadd.f32 %v2759_v47, %v1793_v20 }
 0x225   :  { %v465_v56 = vmul.f32 1.442695, %v464_v40  ;;  %v756_v40 = vmax.f32 %v746_v29, 0.0 }
 0x227   :  { %1672 = vpow2.f32 %v465_v56  ;;  %v2760_v56 = vld [vmem:[#allocation16_spill] sm:$0xff] }
 0x228   :  { %v612_v57 = vpop.f32.mrf.mxu2 }
 0x229   :  { %v613_v26 = vadd.f32 %v612_v57, %v2260_v22  ;;  %v744_v57 = vadd.f32 %v2760_v56, %v1801_v24 }
 0x22b   :  { %1607 = vst.msk [vmem:[%s2687_s3 + $0x10] sm:$0x1f] %vm266_vm2, %v613_v26  ;;  %v618_v8 = vrot.slane %v613_v26, 1  ;;  %v621_v63 = vrot.slane %v613_v26, 2 }
 0x22d   :  { %v2412_v16 = vpop.eup %1672  ;;  %v620_v60 = vmax.f32 %v613_v26, %v618_v8  ;;  %v2761_v8 = vld [vmem:[#allocation8_spill] sm:$0xff] }
 0x22e   :  { %1603 = vmatpush.msk.msrb.mxu1 %vm300_vm3, %v2412_v16  ;;  %v468_v59 = vrot.slane %v2412_v16, 1  ;;  %v471_v21 = vrot.slane %v2412_v16, 2  ;;  %v474_v13 = vrot.slane %v2412_v16, 3 }
 0x22f   :  { %v623_v42 = vmax.f32 %v620_v60, %v621_v63  ;;  %1604 = vmatmul.msk.f32.vlgmr.msrb.gmra.mxu1 %vm296_vm4, %v2282_v39  ;;  %v754_v63 = vmax.f32 %v744_v57, 0.0 }
 0x230   :  { %532 = vmatpush.msra.mxu1 %v2305_v51  ;;  %v470_v11 = vadd.f32 %v2412_v16, %v468_v59 }
 0x231   :  { %v625_v0 = vrot.slane %v623_v42, 2  ;;  %v2762_v42 = vld [vmem:[#allocation9_spill] sm:$0xff] }
 0x232   :  { %533 = vmatpush.msra.mxu1 %v2314_v61 }
 0x233   :  { %v627_v55 = vmax.f32 %v620_v60, %v625_v0  ;;  %v731_v60 = vadd.f32 %v2761_v8, %v1803_v25  ;;  %v742_v0 = vadd.f32 %v2762_v42, %v2222_v48 }
 0x234   :  { %534 = vmatpush.msra.mxu1 %v2324_v7 }
 0x235   :  { %v628_v37 = vperm.slane %v627_v55, 0  ;;  %v2763_v55 = vld [vmem:[#allocation17_spill] sm:$0xff]  ;;  %v741_v58 = vadd.f32 %v731_v60, %v2231_v1 }
 0x236   :  { %535 = vmatpush.msra.mxu1 %v2331_v38  ;;  %v753_v44 = vmax.f32 %v2763_v55, 0.0 }
 0x237   :  { %v629_v49 = vsub.f32 %v613_v26, %v628_v37  ;;  %v755_v26 = vmax.f32 %v745_v35, 0.0  ;;  %v752_v37 = vmax.f32 %v742_v0, 0.0  ;;  %v751_v5 = vmax.f32 %v741_v58, 0.0 }
 0x238   :  { %536 = vmatpush.msra.mxu1 %v2369_v36 }
 0x239   :  { %v630_v52 = vmul.f32 1.442695, %v629_v49  ;;  %v2764_v49 = vld [vmem:[#allocation18_spill] sm:$0xff] }
 0x23a   :  { %537 = vmatpush.msra.mxu1 %v2374_v45 }
 0x23b   :  { %1674 = vpow2.f32 %v630_v52  ;;  %v750_v52 = vmax.f32 %v2764_v49, 0.0 }
 0x23c   :  { %538 = vmatpush.msra.mxu1 %v2381_v31 }
 0x23e   :  { %539 = vmatpush.msra.mxu1 %v2388_v10 }
 0x240   :  { %766 = vmatpush.msrb.mxu1 %v759_v43  ;;  %v473_v43 = vadd.f32 %v471_v21, %v470_v11 }
 0x241   :  { %v2436_v2 = vpop.eup %1674 }
 0x242   :  { %767 = vmatpush.msrb.mxu1 %v758_v4  ;;  %1608 = vmatpush.msk.msrb.mxu3 %vm300_vm3, %v2436_v2  ;;  %v476_v33 = vadd.f32 %v474_v13, %v473_v43  ;;  %v477_v4 = vrot.slane %v2412_v16, 4 }
 0x243   :  { %1609 = vmatmul.msk.f32.vlgmr.msrb.gmra.mxu3 %vm296_vm4, %v2282_v39 }
 0x244   :  { %768 = vmatpush.msrb.mxu1 %v757_v41  ;;  %697 = vmatpush.msra.mxu3 %v2305_v51  ;;  %v479_v32 = vadd.f32 %v477_v4, %v476_v33  ;;  %v633_v41 = vrot.slane %v2436_v2, 1 }
 0x246   :  { %769 = vmatpush.msrb.mxu1 %v756_v40  ;;  %698 = vmatpush.msra.mxu3 %v2314_v61  ;;  %1676 = vrcp.f32 %v479_v32  ;;  %v635_v35 = vadd.f32 %v2436_v2, %v633_v41  ;;  %v636_v40 = vrot.slane %v2436_v2, 2  ;;  %v513_v16 = vand.u32 2147483648, %v479_v32 }
 0x247   :  { %vm507_vm11 = vweird.f32 %v479_v32  ;;  %v511_v55 = vand.u32 2147483647, %v479_v32 }
 0x248   :  { %770 = vmatpush.msrb.mxu1 %v755_v26  ;;  %699 = vmatpush.msra.mxu3 %v2324_v7  ;;  %v638_v57 = vadd.f32 %v636_v40, %v635_v35  ;;  %v639_v26 = vrot.slane %v2436_v2, 3  ;;  %v514_v58 = vor.u32 1.1754944e-38, %v513_v16 }
 0x249   :  { %vm512_vm13 = vcmp.eq.f32.partialorder %v511_v55, 8.507059e+37 }
 0x24a   :  { %771 = vmatpush.msrb.mxu1 %v754_v63  ;;  %700 = vmatpush.msra.mxu3 %v2331_v38  ;;  %v641_v60 = vadd.f32 %v639_v26, %v638_v57  ;;  %v642_v63 = vrot.slane %v2436_v2, 4  ;;  %v1116_v2 = vrot.slane %v2264_v34, 2 }
 0x24c   :  { %772 = vmatpush.msrb.mxu1 %v753_v44  ;;  %701 = vmatpush.msra.mxu3 %v2369_v36  ;;  %v1677_v29 = vpop.eup %1676  ;;  %v644_v0 = vadd.f32 %v642_v63, %v641_v60 }
 0x24d   :  { %v503_v47 = vmul.f32 %v1677_v29, %v479_v32  ;;  %vm508_vm10 = vweird.f32 %v1677_v29 }
 0x24e   :  { %773 = vmatpush.msrb.mxu1 %v752_v37  ;;  %702 = vmatpush.msra.mxu3 %v2374_v45  ;;  %vm509_vm12 = vmor %vm507_vm11, %vm508_vm10  ;;  %1678 = vrcp.f32 %v644_v0  ;;  %v1113_v37 = vrot.slane %v2264_v34, 1  ;;  %vm672_vm15 = vweird.f32 %v644_v0  ;;  %v676_v57 = vand.u32 2147483647, %v644_v0 }
 0x24f   :  { %v504_v56 = vsub.f32 1.0, %v503_v47 }
 0x250   :  { %774 = vmatpush.msrb.mxu1 %v751_v5  ;;  %703 = vmatpush.msra.mxu3 %v2381_v31  ;;  %v1115_v49 = vmax.f32 %v2264_v34, %v1113_v37  ;;  %vm677_vm5 = vcmp.eq.f32.partialorder %v676_v57, 8.507059e+37 }
 0x251   :  { %v505_v8 = vmul.f32 %v1677_v29, %v504_v56  ;;  %v678_v56 = vand.u32 2147483648, %v644_v0 }
 0x252   :  { %775 = vmatpush.msrb.mxu1 %v750_v52  ;;  %704 = vmatpush.msra.mxu3 %v2388_v10  ;;  %v1118_v43 = vmax.f32 %v1115_v49, %v1116_v2 }
 0x253   :  { %v506_v42 = vadd.f32 %v1677_v29, %v505_v8  ;;  %v679_v63 = vor.u32 1.1754944e-38, %v678_v56 }
 0x254   :  { %862 = vmatpush.msrb.mxu3 %v2305_v51  ;;  %v1679_v59 = vpop.eup %1678  ;;  %v1120_v32 = vrot.slane %v1118_v43, 2 }
 0x255   :  { %v510_v44 = vsel %vm509_vm12, %v1677_v29, %v506_v42  ;;  %v668_v33 = vmul.f32 %v1679_v59, %v644_v0  ;;  %vm673_vm14 = vweird.f32 %v1679_v59 }
 0x256   :  { %863 = vmatpush.msrb.mxu3 %v2314_v61  ;;  %v515_v5 = vsel %vm512_vm13, %v514_v58, %v510_v44  ;;  %v1122_v41 = vmax.f32 %v1115_v49, %v1120_v32  ;;  %vm674_vm0 = vmor %vm672_vm15, %vm673_vm14 }
 0x257   :  { %v517_v52 = vperm.slane %v515_v5, 0  ;;  %v669_v29 = vsub.f32 1.0, %v668_v33 }
 0x258   :  { %864 = vmatpush.msrb.mxu3 %v2324_v7  ;;  %v1123_v35 = vperm.slane %v1122_v41, 0 }
 0x259   :  { %v670_v47 = vmul.f32 %v1679_v59, %v669_v29  ;;  %v2497_v29 = vpop.permute.xlu2 %384 }
 0x25a   :  { %865 = vmatpush.msrb.mxu3 %v2331_v38  ;;  %v1124_v8 = vsub.f32 %v2264_v34, %v1123_v35  ;;  %v2493_v34 = vpop.permute.xlu1 %371 }
 0x25b   :  { %v671_v40 = vadd.f32 %v1679_v59, %v670_v47 }
 0x25c   :  { %866 = vmatpush.msrb.mxu3 %v2369_v36  ;;  %v1125_v16 = vmul.f32 1.442695, %v1124_v8 }
 0x25d   :  { %v675_v60 = vsel %vm674_vm0, %v1679_v59, %v671_v40  ;;  %vm1566_vm0 = vcmask 1041408  }
 0x25e   :  { %867 = vmatpush.msrb.mxu3 %v2374_v45  ;;  %v680_v42 = vsel %vm677_vm5, %v679_v63, %v675_v60  ;;  %1680 = vpow2.f32 %v1125_v16  ;;  %vm1568_vm5 = vcmask 1042432  }
 0x25f   :  { %v682_v55 = vperm.slane %v680_v42, 0 }
 0x260   :  { %868 = vmatpush.msrb.mxu3 %v2381_v31 }
 0x262   :  { %869 = vmatpush.msrb.mxu3 %v2388_v10 }
 0x264   :  { %v2488_v49 = vpop.eup %1680 }
 0x28a   :  { %v367_v26 = vpop.f32.mrf.mxu3 }
 0x28b   :  { %v374_v0 = vmul.f32 %v2493_v34, %v367_v26 }
 0x28d   :  { %v379_v43 = vrot.slane %v374_v0, 2 }
 0x2ac   :  { %v499_v11 = vpop.f32.mrf.mxu1 }
 0x2ad   :  { %v518_v21 = vmul.f32 %v517_v52, %v499_v11  ;;  %v376_v52 = vrot.slane %v374_v0, 1 }
 0x2af   :  { %v519_v13 = vadd.f32 %v518_v21, %v2395_v50  ;;  %v378_v2 = vadd.f32 %v376_v52, %v374_v0 }
 0x2b1   :  { %v520_v4 = vmax.f32 %v519_v13, 0.0 }
 0x2b3   :  { %1605 = vmatmul.msk.f32.vlgmr.msra.gmra.mxu1 %vm346_vm9, %v520_v4  ;;  %v381_v4 = vadd.f32 %v379_v43, %v378_v2  ;;  %v2766_v43 = vld [vmem:[#allocation36_spill] sm:$0xff] }
 0x2b5   :  { %v387_v40 = vadd.f32 %v2497_v29, %v381_v4  ;;  %v2767_v4 = vld [vmem:[#allocation31_spill] sm:$0xff] }
 0x2bb   :  { %1611 = vmatmul.msk.f32.vlgmr.msrb.gmra.mxu1 %vm243_vm1, %v2116_v12 }
 0x2c6   :  { %v664_v44 = vpop.f32.mrf.mxu3 }
 0x2c7   :  { %v683_v58 = vmul.f32 %v682_v55, %v664_v44 }
 0x2c9   :  { %v684_v37 = vadd.f32 %v683_v58, %v2395_v50  ;;  %v1700_v58 = vld [vmem:[%s2686_s0 + $0xc] ss:$0 sm:$0xff] }
 0x2cb   :  { %v685_v5 = vmax.f32 %v684_v37, 0.0  ;;  %v894_v37 = vmul.f32 %v1700_v58, %v1789_v18 }
 0x2cd   :  { %1610 = vmatmul.msk.f32.vlgmr.msra.gmra.mxu3 %vm346_vm9, %v685_v5  ;;  %v904_v0 = vadd.f32 %v894_v37, %v2157_v62 }
 0x2ce   :  { %1623 = vmatpush.msk.msra.mxu3 %vm300_vm3, %v2488_v49 }
 0x2cf   :  { %v914_v52 = vadd.f32 %v904_v0, %v1791_v19 }
 0x330   :  { %v541_v59 = vpop.f32.mrf.mxu1 }
 0x331   :  { %v544_v11 = vmul.f32 %v541_v59, %v2493_v34  ;;  %v2765_v59 = vld [vmem:[#allocation44_spill] sm:$0xff] }
 0x333   :  { %v546_v21 = vrot.slane %v544_v11, 1  ;;  %v549_v33 = vrot.slane %v544_v11, 2 }
 0x335   :  { %v548_v13 = vadd.f32 %v546_v21, %v544_v11  ;;  %v913_v11 = vadd.f32 %v2765_v59, %v1781_v14  ;;  %v924_v21 = vmax.f32 %v914_v52, 0.0  ;;  %v2773_v52 = vld [vmem:[#allocation27_spill] sm:$0xff] }
 0x336   :  { %v915_v59 = vmax.f32 %v2773_v52, 0.0 }
 0x337   :  { %v551_v32 = vadd.f32 %v549_v33, %v548_v13  ;;  %v912_v13 = vadd.f32 %v2766_v43, %v1799_v23  ;;  %v923_v33 = vmax.f32 %v913_v11, 0.0  ;;  %v1701_v11 = vld [vmem:[%s2686_s0 + $0xf] ss:$0 sm:$0xff] }
 0x338   :  { %v777_v41 = vpop.f32.mrf.mxu1 }
 0x339   :  { %v552_v47 = vadd.f32 %v551_v32, %v2497_v29  ;;  %v778_v35 = vadd.f32 %v777_v41, %v2260_v22  ;;  %v911_v32 = vadd.f32 %v2767_v4, %v1783_v15  ;;  %v922_v41 = vmax.f32 %v912_v13, 0.0  ;;  %v2774_v13 = vld [vmem:[#allocation45_spill] sm:$0xff] }
 0x33b   :  { %v1544_v56 = vrot.slane %v552_v47, 7  ;;  %1612 = vst.msk [vmem:[%s2687_s3 + $0x18] sm:$0x1f] %vm266_vm2, %v778_v35  ;;  %v783_v57 = vrot.slane %v778_v35, 1  ;;  %v786_v60 = vrot.slane %v778_v35, 2  ;;  %v2768_v47 = vld [vmem:[#allocation23_spill] sm:$0xff] }
 0x33d   :  { %v2506_v26 = vsel %vm1564_vm6, %v387_v40, %v1544_v56  ;;  %v785_v8 = vmax.f32 %v778_v35, %v783_v57  ;;  %v921_v40 = vmax.f32 %v911_v32, 0.0  ;;  %v2769_v56 = vld [vmem:[#allocation19_spill] sm:$0xff]  ;;  %v2775_v32 = vld [vmem:[#allocation37_spill] sm:$0xff] }
 0x33e   :  { %v909_v57 = vadd.f32 %v2769_v56, %v1801_v24 }
 0x33f   :  { %v788_v63 = vmax.f32 %v785_v8, %v786_v60  ;;  %v2770_v60 = vld [vmem:[#allocation26_spill] sm:$0xff] }
 0x341   :  { %v790_v42 = vrot.slane %v788_v63, 2  ;;  %v896_v63 = vadd.f32 %v2770_v60, %v1803_v25 }
 0x343   :  { %v792_v16 = vmax.f32 %v785_v8, %v790_v42  ;;  %v919_v42 = vmax.f32 %v909_v57, 0.0  ;;  %v906_v37 = vadd.f32 %v896_v63, %v2231_v1  ;;  %v2777_v57 = vld [vmem:[#allocation38_spill] sm:$0xff]  ;;  %v2778_v63 = vld [vmem:[#allocation39_spill] sm:$0xff] }
 0x345   :  { %v793_v55 = vperm.slane %v792_v16, 0  ;;  %v2771_v16 = vld [vmem:[#allocation25_spill] sm:$0xff]  ;;  %v916_v0 = vmax.f32 %v906_v37, 0.0  ;;  %v2780_v37 = vld [vmem:[#allocation40_spill] sm:$0xff] }
 0x347   :  { %v794_v44 = vsub.f32 %v778_v35, %v793_v55  ;;  %v910_v35 = vadd.f32 %v2768_v47, %v1793_v20  ;;  %v907_v55 = vadd.f32 %v2771_v16, %v2222_v48 }
 0x349   :  { %v795_v5 = vmul.f32 1.442695, %v794_v44  ;;  %v920_v8 = vmax.f32 %v910_v35, 0.0  ;;  %v2772_v44 = vld [vmem:[#allocation24_spill] sm:$0xff] }
 0x34a   :  { %v918_v58 = vmax.f32 %v2772_v44, 0.0  ;;  %v2776_v35 = vld [vmem:[#allocation32_spill] sm:$0xff] }
 0x34b   :  { %1682 = vpow2.f32 %v795_v5  ;;  %v917_v5 = vmax.f32 %v907_v55, 0.0  ;;  %v2779_v55 = vld [vmem:[#allocation41_spill] sm:$0xff] }
 0x34c   :  { %v1391_v44 = vadd.f32 %v2779_v55, %v1803_v25 }
 0x351   :  { %v2516_v2 = vpop.eup %1682 }
 0x352   :  { %1613 = vmatpush.msk.msrb.mxu2 %vm300_vm3, %v2516_v2 }
 0x353   :  { %1614 = vmatmul.msk.f32.vlgmr.msrb.gmra.mxu2 %vm296_vm4, %v2282_v39 }
 0x354   :  { %931 = vmatpush.msra.mxu2 %v924_v21  ;;  %v1389_v21 = vmul.f32 %v1701_v11, %v1789_v18 }
 0x356   :  { %932 = vmatpush.msra.mxu2 %v923_v33  ;;  %v1399_v43 = vadd.f32 %v1389_v21, %v2157_v62  ;;  %v1408_v33 = vadd.f32 %v2774_v13, %v1781_v14 }
 0x358   :  { %933 = vmatpush.msra.mxu2 %v922_v41  ;;  %v1407_v41 = vadd.f32 %v2775_v32, %v1799_v23  ;;  %v1418_v47 = vmax.f32 %v1408_v33, 0.0  ;;  %v801_v33 = vrot.slane %v2516_v2, 2  ;;  %v804_v32 = vrot.slane %v2516_v2, 3 }
 0x35a   :  { %934 = vmatpush.msra.mxu2 %v921_v40  ;;  %v1406_v40 = vadd.f32 %v2776_v35, %v1783_v15  ;;  %v1417_v56 = vmax.f32 %v1407_v41, 0.0 }
 0x35c   :  { %935 = vmatpush.msra.mxu2 %v920_v8  ;;  %v1405_v8 = vadd.f32 %v2777_v57, %v1793_v20  ;;  %v1416_v60 = vmax.f32 %v1406_v40, 0.0 }
 0x35e   :  { %936 = vmatpush.msra.mxu2 %v919_v42  ;;  %v1404_v42 = vadd.f32 %v2778_v63, %v1801_v24  ;;  %v1415_v16 = vmax.f32 %v1405_v8, 0.0 }
 0x360   :  { %937 = vmatpush.msra.mxu2 %v918_v58  ;;  %v1414_v58 = vmax.f32 %v1404_v42, 0.0 }
 0x362   :  { %938 = vmatpush.msra.mxu2 %v917_v5  ;;  %v1402_v5 = vadd.f32 %v2780_v37, %v2222_v48 }
 0x364   :  { %939 = vmatpush.msra.mxu2 %v916_v0  ;;  %v2781_v0 = vld [vmem:[#allocation46_spill] sm:$0xff]  ;;  %v1412_v11 = vmax.f32 %v1402_v5, 0.0 }
 0x365   :  { %v1413_v52 = vmax.f32 %v2781_v0, 0.0 }
 0x366   :  { %940 = vmatpush.msra.mxu2 %v915_v59  ;;  %v1401_v59 = vadd.f32 %v1391_v44, %v2231_v1 }
 0x367   :  { %1616 = vmatmul.msk.f32.vlgmr.msra.gmra.mxu2 %vm243_vm1, %v2116_v12  ;;  %v1409_v12 = vadd.f32 %v1399_v43, %v1791_v19  ;;  %v1410_v43 = vmax.f32 %v2189_v30, 0.0 }
 0x368   :  { %1192 = vmatpush.msrb.mxu2 %v2305_v51  ;;  %v1411_v21 = vmax.f32 %v1401_v59, 0.0 }
 0x369   :  { %v1419_v4 = vmax.f32 %v1409_v12, 0.0  ;;  %v798_v12 = vrot.slane %v2516_v2, 1 }
 0x36a   :  { %1193 = vmatpush.msrb.mxu2 %v2314_v61 }
 0x36b   :  { %v800_v13 = vadd.f32 %v2516_v2, %v798_v12  ;;  %v1242_v12 = vadd.f32 %v2234_v6, %v1799_v23  ;;  %v1226_v23 = vadd.f32 %v2209_v27, %v1803_v25 }
 0x36c   :  { %1194 = vmatpush.msrb.mxu2 %v2324_v7 }
 0x36e   :  { %1195 = vmatpush.msrb.mxu2 %v2331_v38 }
 0x370   :  { %1196 = vmatpush.msrb.mxu2 %v2369_v36 }
 0x372   :  { %1197 = vmatpush.msrb.mxu2 %v2374_v45 }
 0x374   :  { %1198 = vmatpush.msrb.mxu2 %v2381_v31 }
 0x376   :  { %1199 = vmatpush.msrb.mxu2 %v2388_v10 }
 0x378   :  { %1426 = vmatpush.msra.mxu2 %v1419_v4  ;;  %v803_v4 = vadd.f32 %v801_v33, %v800_v13  ;;  %v1252_v13 = vmax.f32 %v1242_v12, 0.0 }
 0x37a   :  { %1427 = vmatpush.msra.mxu2 %v1418_v47  ;;  %v806_v41 = vadd.f32 %v804_v32, %v803_v4  ;;  %v807_v47 = vrot.slane %v2516_v2, 4  ;;  %v1702_v2 = vld [vmem:[%s2686_s0 + $0xe] ss:$0 sm:$0xff]  ;;  %v2610_v4 = vld [vmem:[%s2685_s1 + $0x50] sm:$0x1f] }
 0x37b   :  { %v1224_v44 = vmul.f32 %v1702_v2, %v1789_v18 }
 0x37c   :  { %1428 = vmatpush.msra.mxu2 %v1417_v56  ;;  %v809_v35 = vadd.f32 %v807_v47, %v806_v41 }
 0x37e   :  { %1429 = vmatpush.msra.mxu2 %v1416_v60  ;;  %1684 = vrcp.f32 %v809_v35  ;;  %v843_v60 = vand.u32 2147483648, %v809_v35  ;;  %vm837_vm8 = vweird.f32 %v809_v35  ;;  %v841_v63 = vand.u32 2147483647, %v809_v35 }
 0x380   :  { %1430 = vmatpush.msra.mxu2 %v1415_v16  ;;  %v844_v16 = vor.u32 1.1754944e-38, %v843_v60  ;;  %vm842_vm11 = vcmp.eq.f32.partialorder %v841_v63, 8.507059e+37 }
 0x382   :  { %1431 = vmatpush.msra.mxu2 %v1414_v58  ;;  %v1234_v58 = vadd.f32 %v1224_v44, %v2157_v62  ;;  %v1241_v62 = vadd.f32 %v2192_v17, %v1783_v15  ;;  %v1237_v17 = vadd.f32 %v2216_v54, %v2222_v48  ;;  %v1245_v54 = vmax.f32 %v2237_v9, 0.0 }
 0x384   :  { %1432 = vmatpush.msra.mxu2 %v1413_v52  ;;  %v1685_v40 = vpop.eup %1684  ;;  %v1244_v52 = vadd.f32 %v1234_v58, %v1791_v19  ;;  %v1240_v19 = vadd.f32 %v2205_v46, %v1793_v20  ;;  %v1251_v33 = vmax.f32 %v1241_v62, 0.0  ;;  %v1248_v20 = vmax.f32 %v2213_v53, 0.0 }
 0x385   :  { %v833_v56 = vmul.f32 %v1685_v40, %v809_v35  ;;  %vm838_vm7 = vweird.f32 %v1685_v40  ;;  %v1236_v46 = vadd.f32 %v1226_v23, %v2231_v1 }
 0x386   :  { %1433 = vmatpush.msra.mxu2 %v1412_v11  ;;  %vm839_vm10 = vmor %vm837_vm8, %vm838_vm7  ;;  %v1243_v11 = vadd.f32 %v2254_v3, %v1781_v14  ;;  %v1239_v14 = vadd.f32 %v2198_v28, %v1801_v24  ;;  %v1250_v3 = vmax.f32 %v1240_v19, 0.0  ;;  %v1247_v24 = vmax.f32 %v1237_v17, 0.0 }
 0x387   :  { %v834_v57 = vsub.f32 1.0, %v833_v56  ;;  %v1246_v25 = vmax.f32 %v1236_v46, 0.0  ;;  %v1128_v56 = vrot.slane %v2488_v49, 1 }
 0x388   :  { %1434 = vmatpush.msra.mxu2 %v1411_v21  ;;  %v1253_v18 = vmax.f32 %v1243_v11, 0.0  ;;  %v1249_v15 = vmax.f32 %v1239_v14, 0.0 }
 0x389   :  { %v835_v8 = vmul.f32 %v1685_v40, %v834_v57 }
 0x38a   :  { %1435 = vmatpush.msra.mxu2 %v1410_v43  ;;  %v1254_v43 = vmax.f32 %v1244_v52, 0.0 }
 0x38b   :  { %v836_v30 = vadd.f32 %v1685_v40, %v835_v8 }
 0x38d   :  { %v840_v42 = vsel %vm839_vm10, %v1685_v40, %v836_v30  ;;  %v706_v30 = vpop.f32.mrf.mxu3 }
 0x38e   :  { %v845_v55 = vsel %vm842_vm11, %v844_v16, %v840_v42 }
 0x38f   :  { %v847_v37 = vperm.slane %v845_v55, 0 }
 0x3d6   :  { %v829_v5 = vpop.f32.mrf.mxu2 }
 0x3d7   :  { %v848_v0 = vmul.f32 %v847_v37, %v829_v5 }
 0x3d9   :  { %v849_v59 = vadd.f32 %v848_v0, %v2395_v50 }
 0x3db   :  { %v850_v21 = vmax.f32 %v849_v59, 0.0 }
 0x3dd   :  { %1615 = vmatmul.msk.f32.vlgmr.msrb.gmra.mxu3 %vm346_vm9, %v850_v21 }
 0x3de   :  { %1261 = vmatpush.msrb.mxu3 %v1254_v43 }
 0x3e0   :  { %1262 = vmatpush.msrb.mxu3 %v1253_v18 }
 0x3e2   :  { %1263 = vmatpush.msrb.mxu3 %v1252_v13 }
 0x3e4   :  { %1264 = vmatpush.msrb.mxu3 %v1251_v33 }
 0x3e5   :  { %1624 = vmatmul.msk.f32.vlgmr.msra.gmra.mxu3 %vm296_vm4, %v2282_v39 }
 0x3e6   :  { %1265 = vmatpush.msrb.mxu3 %v1250_v3 }
 0x3e8   :  { %1266 = vmatpush.msrb.mxu3 %v1249_v15 }
 0x3ea   :  { %v942_v6 = vpop.f32.mrf.mxu2  ;;  %1267 = vmatpush.msrb.mxu3 %v1248_v20 }
 0x3eb   :  { %v943_v28 = vadd.f32 %v942_v6, %v2260_v22 }
 0x3ec   :  { %1268 = vmatpush.msrb.mxu3 %v1247_v24 }
 0x3ed   :  { %1617 = vst.msk [vmem:[%s2687_s3 + $0x20] sm:$0x1f] %vm266_vm2, %v943_v28  ;;  %v948_v27 = vrot.slane %v943_v28, 1  ;;  %v951_v53 = vrot.slane %v943_v28, 2 }
 0x3ee   :  { %1269 = vmatpush.msrb.mxu3 %v1246_v25 }
 0x3ef   :  { %v950_v48 = vmax.f32 %v943_v28, %v948_v27 }
 0x3f0   :  { %1270 = vmatpush.msrb.mxu3 %v1245_v54 }
 0x3f1   :  { %v953_v1 = vmax.f32 %v950_v48, %v951_v53  ;;  %1626 = vmatmul.msk.f32.vlgmr.msrb.gmra.mxu3 %vm243_vm1, %v2610_v4 }
 0x3f2   :  { %1522 = vmatpush.msra.mxu3 %v2305_v51 }
 0x3f3   :  { %v955_v32 = vrot.slane %v953_v1, 2 }
 0x3f4   :  { %1523 = vmatpush.msra.mxu3 %v2314_v61 }
 0x3f5   :  { %v957_v41 = vmax.f32 %v950_v48, %v955_v32 }
 0x3f6   :  { %1524 = vmatpush.msra.mxu3 %v2324_v7 }
 0x3f7   :  { %v958_v9 = vperm.slane %v957_v41, 0 }
 0x3f8   :  { %1525 = vmatpush.msra.mxu3 %v2331_v38 }
 0x3f9   :  { %v959_v47 = vsub.f32 %v943_v28, %v958_v9 }
 0x3fa   :  { %1526 = vmatpush.msra.mxu3 %v2369_v36 }
 0x3fb   :  { %v960_v35 = vmul.f32 1.442695, %v959_v47 }
 0x3fc   :  { %1527 = vmatpush.msra.mxu3 %v2374_v45 }
 0x3fd   :  { %1686 = vpow2.f32 %v960_v35 }
 0x3fe   :  { %1528 = vmatpush.msra.mxu3 %v2381_v31 }
 0x400   :  { %1529 = vmatpush.msra.mxu3 %v2388_v10 }
 0x403   :  { %v1687_v40 = vpop.eup %1686 }
 0x404   :  { %1618 = vmatpush.msk.msra.mxu1 %vm300_vm3, %v1687_v40  ;;  %v966_v63 = vrot.slane %v1687_v40, 2  ;;  %v969_v2 = vrot.slane %v1687_v40, 3  ;;  %v972_v5 = vrot.slane %v1687_v40, 4 }
 0x405   :  { %1619 = vmatmul.msk.f32.vlgmr.msra.gmra.mxu1 %vm296_vm4, %v2282_v39  ;;  %v1130_v39 = vadd.f32 %v2488_v49, %v1128_v56 }
 0x406   :  { %1027 = vmatpush.msrb.mxu1 %v2305_v51  ;;  %v1131_v51 = vrot.slane %v2488_v49, 2 }
 0x408   :  { %1028 = vmatpush.msrb.mxu1 %v2314_v61  ;;  %v1133_v57 = vadd.f32 %v1131_v51, %v1130_v39  ;;  %v1134_v61 = vrot.slane %v2488_v49, 3 }
 0x40a   :  { %1029 = vmatpush.msrb.mxu1 %v2324_v7  ;;  %v1136_v7 = vadd.f32 %v1134_v61, %v1133_v57 }
 0x40c   :  { %1030 = vmatpush.msrb.mxu1 %v2331_v38  ;;  %v1137_v38 = vrot.slane %v2488_v49, 4 }
 0x40e   :  { %1031 = vmatpush.msrb.mxu1 %v2369_v36  ;;  %v1139_v8 = vadd.f32 %v1137_v38, %v1136_v7 }
 0x410   :  { %1032 = vmatpush.msrb.mxu1 %v2374_v45  ;;  %1688 = vrcp.f32 %v1139_v8  ;;  %v963_v45 = vrot.slane %v1687_v40, 1  ;;  %v1173_v52 = vand.u32 2147483648, %v1139_v8  ;;  %vm1167_vm13 = vweird.f32 %v1139_v8 }
 0x411   :  { %v1171_v11 = vand.u32 2147483647, %v1139_v8 }
 0x412   :  { %1033 = vmatpush.msrb.mxu1 %v2381_v31  ;;  %v965_v60 = vadd.f32 %v1687_v40, %v963_v45  ;;  %v1174_v62 = vor.u32 1.1754944e-38, %v1173_v52 }
 0x413   :  { %vm1172_vm15 = vcmp.eq.f32.partialorder %v1171_v11, 8.507059e+37 }
 0x414   :  { %1034 = vmatpush.msrb.mxu1 %v2388_v10  ;;  %v709_v10 = vmul.f32 %v706_v30, %v2493_v34  ;;  %v968_v16 = vadd.f32 %v966_v63, %v965_v60 }
 0x416   :  { %v1689_v36 = vpop.eup %1688  ;;  %v711_v55 = vrot.slane %v709_v10, 1  ;;  %v971_v58 = vadd.f32 %v969_v2, %v968_v16  ;;  %v714_v49 = vrot.slane %v709_v10, 2  ;;  %v1704_v16 = vld [vmem:[%s2685_s1 + $0x58] sm:$0x7] }
 0x417   :  { %v1163_v31 = vmul.f32 %v1689_v36, %v1139_v8  ;;  %vm1168_vm12 = vweird.f32 %v1689_v36 }
 0x418   :  { %v713_v37 = vadd.f32 %v711_v55, %v709_v10  ;;  %v974_v59 = vadd.f32 %v972_v5, %v971_v58  ;;  %vm1169_vm14 = vmor %vm1167_vm13, %vm1168_vm12  ;;  %vm1570_vm13 = vcmask 1043456  }
 0x419   :  { %v1164_v42 = vsub.f32 1.0, %v1163_v31 }
 0x41a   :  { %v716_v21 = vadd.f32 %v714_v49, %v713_v37  ;;  %1690 = vrcp.f32 %v974_v59  ;;  %v1008_v35 = vand.u32 2147483648, %v974_v59  ;;  %vm1002_vm7 = vweird.f32 %v974_v59 }
 0x41b   :  { %v1165_v44 = vmul.f32 %v1689_v36, %v1164_v42  ;;  %v1006_v39 = vand.u32 2147483647, %v974_v59 }
 0x41c   :  { %v717_v19 = vadd.f32 %v716_v21, %v2497_v29  ;;  %v1009_v61 = vor.u32 1.1754944e-38, %v1008_v35 }
 0x41d   :  { %v1166_v0 = vadd.f32 %v1689_v36, %v1165_v44  ;;  %vm1007_vm10 = vcmp.eq.f32.partialorder %v1006_v39, 8.507059e+37 }
 0x41e   :  { %v1547_v20 = vrot.slane %v717_v19, 6 }
 0x41f   :  { %v1170_v18 = vsel %vm1169_vm14, %v1689_v36, %v1166_v0 }
 0x420   :  { %v1175_v33 = vsel %vm1172_vm15, %v1174_v62, %v1170_v18  ;;  %v1691_v17 = vpop.eup %1690  ;;  %v1567_v54 = vsel %vm1566_vm0, %v2506_v26, %v1547_v20  ;;  %vm1573_vm0 = vcmask 1045504  }
 0x421   :  { %v1177_v15 = vperm.slane %v1175_v33, 0  ;;  %v998_v27 = vmul.f32 %v1691_v17, %v974_v59  ;;  %vm1003_vm6 = vweird.f32 %v1691_v17 }
 0x422   :  { %vm1004_vm8 = vmor %vm1002_vm7, %vm1003_vm6 }
 0x423   :  { %v999_v1 = vsub.f32 1.0, %v998_v27 }
 0x425   :  { %v1000_v32 = vmul.f32 %v1691_v17, %v999_v1 }
 0x427   :  { %v1001_v26 = vadd.f32 %v1691_v17, %v1000_v32 }
 0x429   :  { %v1005_v57 = vsel %vm1004_vm8, %v1691_v17, %v1001_v26 }
 0x42a   :  { %v1010_v38 = vsel %vm1007_vm10, %v1009_v61, %v1005_v57 }
 0x42b   :  { %v1012_v45 = vperm.slane %v1010_v38, 0 }
 0x460   :  { %v871_v43 = vpop.f32.mrf.mxu3 }
 0x461   :  { %v874_v12 = vmul.f32 %v871_v43, %v2493_v34 }
 0x463   :  { %v876_v13 = vrot.slane %v874_v12, 1  ;;  %v879_v3 = vrot.slane %v874_v12, 2 }
 0x465   :  { %v878_v14 = vadd.f32 %v876_v13, %v874_v12 }
 0x467   :  { %v881_v23 = vadd.f32 %v879_v3, %v878_v14 }
 0x468   :  { %v1159_v46 = vpop.f32.mrf.mxu3 }
 0x469   :  { %v882_v6 = vadd.f32 %v881_v23, %v2497_v29  ;;  %v1178_v24 = vmul.f32 %v1177_v15, %v1159_v46 }
 0x46b   :  { %v1550_v28 = vrot.slane %v882_v6, 5  ;;  %v1179_v25 = vadd.f32 %v1178_v24, %v2395_v50 }
 0x46d   :  { %v2644_v48 = vsel %vm1568_vm5, %v1567_v54, %v1550_v28  ;;  %v1180_v53 = vmax.f32 %v1179_v25, 0.0  ;;  %vm1577_vm5 = vcmask 15360  }
 0x46f   :  { %1625 = vmatmul.msk.f32.vlgmr.msrb.gmra.mxu2 %vm346_vm9, %v1180_v53 }
 0x474   :  { %v1272_v41 = vpop.f32.mrf.mxu3 }
 0x475   :  { %v1273_v9 = vadd.f32 %v1272_v41, %v2260_v22 }
 0x477   :  { %1627 = vst.msk [vmem:[%s2687_s3 + $0x30] sm:$0x1f] %vm266_vm2, %v1273_v9  ;;  %v1278_v47 = vrot.slane %v1273_v9, 1  ;;  %1631 = vmatmul.msk.f32.vlgmr.msra.gmra.mxu2 %vm243_vm1, %v2610_v4  ;;  %v1281_v56 = vrot.slane %v1273_v9, 2 }
 0x479   :  { %v1280_v40 = vmax.f32 %v1273_v9, %v1278_v47 }
 0x47b   :  { %v1283_v51 = vmax.f32 %v1280_v40, %v1281_v56 }
 0x47d   :  { %v1285_v7 = vrot.slane %v1283_v51, 2 }
 0x47f   :  { %v1287_v8 = vmax.f32 %v1280_v40, %v1285_v7 }
 0x481   :  { %v1288_v36 = vperm.slane %v1287_v8, 0 }
 0x482   :  { %v994_v30 = vpop.f32.mrf.mxu1 }
 0x483   :  { %v1289_v31 = vsub.f32 %v1273_v9, %v1288_v36  ;;  %v1013_v4 = vmul.f32 %v1012_v45, %v994_v30 }
 0x485   :  { %v1290_v60 = vmul.f32 1.442695, %v1289_v31  ;;  %v1014_v10 = vadd.f32 %v1013_v4, %v2395_v50 }
 0x487   :  { %1692 = vpow2.f32 %v1290_v60  ;;  %v1015_v63 = vmax.f32 %v1014_v10, 0.0 }
 0x489   :  { %1620 = vmatmul.msk.f32.vlgmr.msrb.gmra.mxu1 %vm346_vm9, %v1015_v63 }
 0x48d   :  { %v1693_v42 = vpop.eup %1692 }
 0x48e   :  { %1628 = vmatpush.msk.msra.mxu1 %vm300_vm3, %v1693_v42  ;;  %v1293_v55 = vrot.slane %v1693_v42, 1  ;;  %v1296_v44 = vrot.slane %v1693_v42, 2  ;;  %v1299_v37 = vrot.slane %v1693_v42, 3  ;;  %v1302_v0 = vrot.slane %v1693_v42, 4 }
 0x490   :  { %v1295_v2 = vadd.f32 %v1693_v42, %v1293_v55 }
 0x491   :  { %1629 = vmatmul.msk.f32.vlgmr.msra.gmra.mxu1 %vm296_vm4, %v1704_v16 }
 0x492   :  { %v1298_v58 = vadd.f32 %v1296_v44, %v1295_v2 }
 0x494   :  { %v1301_v5 = vadd.f32 %v1299_v37, %v1298_v58 }
 0x496   :  { %v1304_v49 = vadd.f32 %v1302_v0, %v1301_v5 }
 0x498   :  { %1694 = vrcp.f32 %v1304_v49  ;;  %v1338_v23 = vand.u32 2147483648, %v1304_v49  ;;  %vm1332_vm11 = vweird.f32 %v1304_v49  ;;  %v1336_v17 = vand.u32 2147483647, %v1304_v49 }
 0x49a   :  { %v1339_v24 = vor.u32 1.1754944e-38, %v1338_v23 }
 0x49e   :  { %v1695_v59 = vpop.eup %1694 }
 0x49f   :  { %v1328_v11 = vmul.f32 %v1695_v59, %v1304_v49  ;;  %vm1333_vm1 = vweird.f32 %v1695_v59 }
 0x4a0   :  { %vm1334_vm12 = vmor %vm1332_vm11, %vm1333_vm1 }
 0x4a1   :  { %v1329_v12 = vsub.f32 1.0, %v1328_v11 }
 0x4a3   :  { %v1330_v19 = vmul.f32 %v1695_v59, %v1329_v12 }
 0x4a5   :  { %v1331_v3 = vadd.f32 %v1695_v59, %v1330_v19 }
 0x4a7   :  { %v1335_v6 = vsel %vm1334_vm12, %v1695_v59, %v1331_v3 }
 0x4f2   :  { %v1201_v52 = vpop.f32.mrf.mxu2 }
 0x4f3   :  { %v1204_v57 = vmul.f32 %v1201_v52, %v2493_v34 }
 0x4f5   :  { %v1206_v61 = vrot.slane %v1204_v57, 1  ;;  %v1209_v38 = vrot.slane %v1204_v57, 2 }
 0x4f7   :  { %v1208_v7 = vadd.f32 %v1206_v61, %v1204_v57 }
 0x4f9   :  { %v1211_v8 = vadd.f32 %v1209_v38, %v1208_v7 }
 0x4fa   :  { %v1437_v21 = vpop.f32.mrf.mxu2 }
 0x4fb   :  { %v1438_v43 = vadd.f32 %v1437_v21, %v2260_v22  ;;  %v1212_v36 = vadd.f32 %v1211_v8, %v2497_v29 }
 0x4fd   :  { %1632 = vst.msk [vmem:[%s2687_s3 + $0x38] sm:$0x1f] %vm266_vm2, %v1438_v43  ;;  %v1443_v18 = vrot.slane %v1438_v43, 1  ;;  %v1446_v13 = vrot.slane %v1438_v43, 2  ;;  %vm1337_vm2 = vcmp.eq.f32.partialorder %v1336_v17, 8.507059e+37  ;;  %v1556_v45 = vrot.slane %v1212_v36, 3 }
 0x4fe   :  { %v1340_v27 = vsel %vm1337_vm2, %v1339_v24, %v1335_v6 }
 0x4ff   :  { %v1445_v62 = vmax.f32 %v1438_v43, %v1443_v18  ;;  %v1342_v41 = vperm.slane %v1340_v27, 0 }
 0x501   :  { %v1448_v33 = vmax.f32 %v1445_v62, %v1446_v13 }
 0x503   :  { %v1450_v14 = vrot.slane %v1448_v33, 2 }
 0x505   :  { %v1452_v15 = vmax.f32 %v1445_v62, %v1450_v14 }
 0x506   :  { %v1036_v20 = vpop.f32.mrf.mxu1 }
 0x507   :  { %v1453_v22 = vperm.slane %v1452_v15, 0  ;;  %v1039_v46 = vmul.f32 %v1036_v20, %v2493_v34 }
 0x509   :  { %v1454_v28 = vsub.f32 %v1438_v43, %v1453_v22  ;;  %v1041_v25 = vrot.slane %v1039_v46, 1  ;;  %v1044_v1 = vrot.slane %v1039_v46, 2 }
 0x50b   :  { %v1455_v54 = vmul.f32 1.442695, %v1454_v28  ;;  %v1043_v53 = vadd.f32 %v1041_v25, %v1039_v46 }
 0x50d   :  { %1696 = vpow2.f32 %v1455_v54  ;;  %v1046_v32 = vadd.f32 %v1044_v1, %v1043_v53 }
 0x50e   :  { %v1324_v9 = vpop.f32.mrf.mxu1 }
 0x50f   :  { %v1047_v47 = vadd.f32 %v1046_v32, %v2497_v29  ;;  %v1343_v26 = vmul.f32 %v1342_v41, %v1324_v9 }
 0x511   :  { %v1553_v35 = vrot.slane %v1047_v47, 4  ;;  %v1344_v40 = vadd.f32 %v1343_v26, %v2395_v50 }
 0x513   :  { %v1697_v56 = vpop.eup %1696  ;;  %v1571_v39 = vsel %vm1570_vm13, %v2644_v48, %v1553_v35  ;;  %v1345_v51 = vmax.f32 %v1344_v40, 0.0 }
 0x514   :  { %1633 = vmatpush.msk.msrb.mxu1 %vm300_vm3, %v1697_v56  ;;  %v1572_v30 = vsel %vm300_vm3, %v1571_v39, %v1556_v45  ;;  %v1458_v31 = vrot.slane %v1697_v56, 1  ;;  %v1461_v4 = vrot.slane %v1697_v56, 2  ;;  %v1464_v10 = vrot.slane %v1697_v56, 3 }
 0x515   :  { %1630 = vmatmul.msk.f32.vlgmr.msra.gmra.mxu0 %vm346_vm9, %v1345_v51  ;;  %1634 = vmatmul.msk.f32.vlgmr.msrb.gmra.mxu1 %vm296_vm4, %v1704_v16  ;;  %v1467_v42 = vrot.slane %v1697_v56, 4 }
 0x516   :  { %v1460_v48 = vadd.f32 %v1697_v56, %v1458_v31 }
 0x518   :  { %v1463_v60 = vadd.f32 %v1461_v4, %v1460_v48 }
 0x51a   :  { %v1466_v63 = vadd.f32 %v1464_v10, %v1463_v60 }
 0x51c   :  { %v1469_v55 = vadd.f32 %v1467_v42, %v1466_v63 }
 0x51e   :  { %1698 = vrcp.f32 %v1469_v55  ;;  %v1503_v5 = vand.u32 2147483648, %v1469_v55  ;;  %vm1497_vm14 = vweird.f32 %v1469_v55  ;;  %v1501_v0 = vand.u32 2147483647, %v1469_v55 }
 0x520   :  { %v1504_v52 = vor.u32 1.1754944e-38, %v1503_v5  ;;  %vm1502_vm3 = vcmp.eq.f32.partialorder %v1501_v0, 8.507059e+37 }
 0x524   :  { %v1699_v16 = vpop.eup %1698 }
 0x525   :  { %v1493_v2 = vmul.f32 %v1699_v16, %v1469_v55  ;;  %vm1498_vm4 = vweird.f32 %v1699_v16 }
 0x526   :  { %vm1499_vm15 = vmor %vm1497_vm14, %vm1498_vm4 }
 0x527   :  { %v1494_v44 = vsub.f32 1.0, %v1493_v2 }
 0x529   :  { %v1495_v58 = vmul.f32 %v1699_v16, %v1494_v44 }
 0x52b   :  { %v1496_v37 = vadd.f32 %v1699_v16, %v1495_v58 }
 0x52d   :  { %v1500_v49 = vsel %vm1499_vm15, %v1699_v16, %v1496_v37 }
 0x52e   :  { %v1505_v59 = vsel %vm1502_vm3, %v1504_v52, %v1500_v49 }
 0x52f   :  { %v1507_v11 = vperm.slane %v1505_v59, 0 }
 0x592   :  { %v1489_v21 = vpop.f32.mrf.mxu1  ;;  %v1366_v62 = vpop.f32.mrf.mxu0 }
 0x593   :  { %v1508_v43 = vmul.f32 %v1507_v11, %v1489_v21  ;;  %v1369_v13 = vmul.f32 %v1366_v62, %v2493_v34 }
 0x595   :  { %v1509_v12 = vadd.f32 %v1508_v43, %v2395_v50  ;;  %v1371_v19 = vrot.slane %v1369_v13, 1  ;;  %v1374_v14 = vrot.slane %v1369_v13, 2 }
 0x597   :  { %v1510_v18 = vmax.f32 %v1509_v12, 0.0  ;;  %v1373_v33 = vadd.f32 %v1371_v19, %v1369_v13 }
 0x599   :  { %1635 = vmatmul.msk.f32.vlgmr.msra.gmra.mxu3 %vm346_vm9, %v1510_v18  ;;  %v1376_v3 = vadd.f32 %v1374_v14, %v1373_v33  ;;  %vm1575_vm9 = vcmask 1046528  }
 0x59b   :  { %v1377_v20 = vadd.f32 %v1376_v3, %v2497_v29 }
 0x59d   :  { %v1559_v50 = vrot.slane %v1377_v20, 2 }
 0x59f   :  { %v1574_v25 = vsel %vm1573_vm0, %v1572_v30, %v1559_v50 }
 0x61c   :  { %v1531_v23 = vpop.f32.mrf.mxu3 }
 0x61d   :  { %v1534_v15 = vmul.f32 %v1531_v23, %v2493_v34 }
 0x61f   :  { %v1536_v17 = vrot.slane %v1534_v15, 1  ;;  %v1539_v46 = vrot.slane %v1534_v15, 2 }
 0x621   :  { %v1538_v22 = vadd.f32 %v1536_v17, %v1534_v15 }
 0x623   :  { %v1541_v6 = vadd.f32 %v1539_v46, %v1538_v22 }
 0x625   :  { %v1542_v24 = vadd.f32 %v1541_v6, %v2497_v29 }
 0x627   :  { %v1562_v28 = vrot.slane %v1542_v24, 1 }
 0x629   :  { %v1576_v27 = vsel %vm1575_vm9, %v1574_v25, %v1562_v28 }
 0x62a   :  { %1578 = vst.msk [vmem:[%s2689_s4] sm:$0xff] %vm1577_vm5, %v1576_v27 }

</bundles_post_ra>
